<compile_context>
chip_gen: v6e
topology: v6e:2x2x1
jax: 0.10.0
libtpu: 0.0.40
codegen_flags: <defaults>
</compile_context>

<pallas_src>
import functools

import jax
import jax.numpy as jnp
import numpy as np
from jax import lax
from jax.experimental import pallas as pl
from jax.experimental.pallas import tpu as pltpu

GELU_SCALE = 1.7015043497085571
WS_EPS = 1e-4
RATES = (2, 4, 8, 16)
INV_SQRT2 = 0.7071067811865476


def _gelu_nf(x):
  # exact (erf) gelu, like torch F.gelu default, scaled by the NF constant.
  return 0.5 * x * (1.0 + lax.erf(x * INV_SQRT2)) * GELU_SCALE


# ---------------------------------------------------------------------------
# Pallas kernels (working layout: channels on sublanes, H*W on lanes)
# ---------------------------------------------------------------------------
def _branch_cat_kernel(p_ref, w_ref, b_ref, cat_ref):
  """All 4 dilated 3x3 branches as one block-diagonal im2col matmul + gelu_nf.

  p_ref  : (1, 4*9*C, HW) bf16  im2col patches for the 4 dilation rates
  w_ref  : (C, 4*9*C)     bf16  block-diagonal standardized weights
  b_ref  : (C, 1)         f32   concatenated branch biases
  cat_ref: (1, C, HW)     f32   == torch.cat(branch outputs, dim=1)
  """
  acc = jnp.dot(w_ref[...], p_ref[0], preferred_element_type=jnp.float32)
  acc = acc + b_ref[...]
  cat_ref[0] = _gelu_nf(acc).astype(cat_ref.dtype)


def _fuse_gate_blend_kernel(fp_ref, gp_ref, x_ref, wf_ref, wg_ref, bf_ref,
                            bg_ref, y_ref, *, hw):
  """fuse conv + gate conv + my_layer_norm + sigmoid + NF blend.

  fp_ref: (1, 9*C, HW) bf16  im2col patches of reflection-padded cat
  gp_ref: (1, 9*C, HW) bf16  im2col patches of reflection-padded x
  x_ref : (1, C, HW)   f32
  wf/wg : (C, 9*C)     bf16 ; bf/bg: (C, 1) f32
  y_ref : (1, C, HW)   f32
  """
  out = jnp.dot(wf_ref[...], fp_ref[0], preferred_element_type=jnp.float32)
  out = out + bf_ref[...]
  g = jnp.dot(wg_ref[...], gp_ref[0], preferred_element_type=jnp.float32)
  g = g + bg_ref[...]

  # my_layer_norm over spatial (lane) axis; torch std is unbiased (ddof=1).
  mean = jnp.mean(g, axis=1, keepdims=True)
  var = jnp.sum((g - mean) ** 2, axis=1, keepdims=True) * (1.0 / (hw - 1))
  std = jnp.sqrt(var) + 1e-9
  mask = jax.nn.sigmoid(10.0 * (g - mean) / std)     # 5 * (2 * (g - mean) / std)

  x = x_ref[0].astype(jnp.float32)
  y_ref[0] = ((x * (1.0 - mask) + out * mask) * 1.09).astype(y_ref.dtype)


# ---------------------------------------------------------------------------
# pallas_call wrappers
# ---------------------------------------------------------------------------
def branch_cat_pallas(patches, w_bd, bias, *, C, HW):
  N, K, _ = patches.shape
  return pl.pallas_call(
      _branch_cat_kernel,
      out_shape=jax.ShapeDtypeStruct((N, C, HW), jnp.float32),
      grid=(N,),
      in_specs=[
          pl.BlockSpec((1, K, HW), lambda n: (n, 0, 0)),
          pl.BlockSpec((C, K), lambda n: (0, 0)),
          pl.BlockSpec((C, 1), lambda n: (0, 0)),
      ],
      out_specs=pl.BlockSpec((1, C, HW), lambda n: (n, 0, 0)),
      compiler_params=pltpu.CompilerParams(dimension_semantics=("parallel",)),
  )(patches, w_bd, bias)


def fuse_gate_blend_pallas(fuse_p, gate_p, x_flat, w_fuse, w_gate, b_fuse,
                           b_gate, *, C, HW):
  N, Kf, _ = fuse_p.shape
  Kg = gate_p.shape[1]
  kernel = functools.partial(_fuse_gate_blend_kernel, hw=HW)
  return pl.pallas_call(
      kernel,
      out_shape=jax.ShapeDtypeStruct((N, C, HW), jnp.float32),
      grid=(N,),
      in_specs=[
          pl.BlockSpec((1, Kf, HW), lambda n: (n, 0, 0)),
          pl.BlockSpec((1, Kg, HW), lambda n: (n, 0, 0)),
          pl.BlockSpec((1, C, HW), lambda n: (n, 0, 0)),
          pl.BlockSpec((C, Kf), lambda n: (0, 0)),
          pl.BlockSpec((C, Kg), lambda n: (0, 0)),
          pl.BlockSpec((C, 1), lambda n: (0, 0)),
          pl.BlockSpec((C, 1), lambda n: (0, 0)),
      ],
      out_specs=pl.BlockSpec((1, C, HW), lambda n: (n, 0, 0)),
      compiler_params=pltpu.CompilerParams(dimension_semantics=("parallel",)),
  )(fuse_p, gate_p, x_flat, w_fuse, w_gate, b_fuse, b_gate)


# ---------------------------------------------------------------------------
# Parameter setup / wrapper-side glue
# ---------------------------------------------------------------------------
def standardize_weight(w_oihw, gain):
  """ScaledWSConv2d.get_weight() in JAX (OIHW in, OIHW out)."""
  fan_in = float(np.prod(w_oihw.shape[1:]))
  mean = jnp.mean(w_oihw, axis=(1, 2, 3), keepdims=True)
  var = jnp.var(w_oihw, axis=(1, 2, 3), keepdims=True, ddof=1)  # torch unbiased
  return (w_oihw - mean) / jnp.sqrt(var * fan_in + WS_EPS) * gain


def _to_mat(w_oihw):
  """OIHW -> (O, 9*Cin), matching im2col row order (tap-major, channel-minor)."""
  O, C = w_oihw.shape[:2]
  return jnp.transpose(w_oihw, (0, 2, 3, 1)).reshape(O, 9 * C)


def prepare_params(params, dim):
  """Weight standardization / reshape / bf16 cast, hoisted out of the hot path."""
  mats, biases = [], []
  for i in range(len(RATES)):
    w = standardize_weight(params[f"block{i}_w"], params[f"block{i}_gain"])
    mats.append(_to_mat(w))
    biases.append(params[f"block{i}_b"])
  w_bd = jax.scipy.linalg.block_diag(*mats).astype(jnp.bfloat16)  # (dim, 4*9*dim)
  b_cat = jnp.concatenate(biases).reshape(dim, 1).astype(jnp.float32)
  w_fuse = _to_mat(standardize_weight(
      params["fuse_w"], params["fuse_gain"])).astype(jnp.bfloat16)
  w_gate = _to_mat(standardize_weight(
      params["gate_w"], params["gate_gain"])).astype(jnp.bfloat16)
  return dict(
      w_bd=w_bd, b_cat=b_cat,
      w_fuse=w_fuse,
      b_fuse=params["fuse_b"].reshape(dim, 1).astype(jnp.float32),
      w_gate=w_gate,
      b_gate=params["gate_b"].reshape(dim, 1).astype(jnp.float32))


def _im2col(xpad, H, W, rate, pad):
  """(N, C, Hp, Wp) -> (N, 9*C, H*W) patches for a dilated 3x3 VALID conv."""
  N, C = xpad.shape[:2]
  taps = []
  for kh in range(3):
    for kw in range(3):
      r0 = pad - rate + kh * rate
      c0 = pad - rate + kw * rate
      taps.append(xpad[:, :, r0:r0 + H, c0:c0 + W])
  return jnp.stack(taps, axis=1).reshape(N, 9 * C, H * W)


def aot_block_nf_forward(x_nchw, prep):
  N, C, H, W = x_nchw.shape
  HW = H * W
  P = max(RATES)        # a single reflect pad serves all branches and the gate
  xpad = jnp.pad(x_nchw, ((0, 0), (0, 0), (P, P), (P, P)), mode="reflect")

  # im2col patches in the lane-dense (rows, H*W) layout; bf16 matmul operands.
  branch_p = jnp.concatenate([_im2col(xpad, H, W, r, P) for r in RATES],
                             axis=1).astype(jnp.bfloat16)
  gate_p = _im2col(xpad, H, W, 1, P).astype(jnp.bfloat16)

  # Kernel 1: four dilated branches (one block-diagonal matmul) + gelu_nf -> cat.
  cat = branch_cat_pallas(branch_p, prep["w_bd"], prep["b_cat"], C=C, HW=HW)

  # Reflection-pad cat and im2col it for the fuse conv (XLA layout plumbing).
  cat_pad = jnp.pad(cat.reshape(N, C, H, W),
                    ((0, 0), (0, 0), (1, 1), (1, 1)), mode="reflect")
  fuse_p = _im2col(cat_pad, H, W, 1, 1).astype(jnp.bfloat16)

  # Kernel 2: fuse conv + gate conv + my_layer_norm + sigmoid + NF blend.
  y = fuse_gate_blend_pallas(fuse_p, gate_p, x_nchw.reshape(N, C, HW),
                             prep["w_fuse"], prep["w_gate"], prep["b_fuse"],
                             prep["b_gate"], C=C, HW=HW)
  return y.reshape(N, C, H, W)


def init_params(key, dim):
  params = {}
  keys = jax.random.split(key, 2 * (len(RATES) + 2))
  ki = 0
  for i in range(len(RATES)):
    params[f"block{i}_w"] = 0.1 * jax.random.normal(
        keys[ki], (dim // 4, dim, 3, 3), jnp.float32); ki += 1
    params[f"block{i}_b"] = 0.1 * jax.random.normal(
        keys[ki], (dim // 4,), jnp.float32); ki += 1
    params[f"block{i}_gain"] = jnp.ones((dim // 4, 1, 1, 1), jnp.float32)
  for name in ("fuse", "gate"):
    params[f"{name}_w"] = 0.1 * jax.random.normal(
        keys[ki], (dim, dim, 3, 3), jnp.float32); ki += 1
    params[f"{name}_b"] = 0.1 * jax.random.normal(
        keys[ki], (dim,), jnp.float32); ki += 1
    params[f"{name}_gain"] = jnp.ones((dim, 1, 1, 1), jnp.float32)
  return params


# ---------------------------------------------------------------------------
# Pure-JAX reference (for correctness check only); operand_dtype controls the
# precision of the conv inputs (f32 = exact module semantics, bf16 = matched
# to the kernels' matmul-operand precision; accumulation is f32 in both).
# ---------------------------------------------------------------------------
def _conv_ref(xpad, w_oihw, b, rate, operand_dtype):
  y = lax.conv_general_dilated(
      xpad.astype(operand_dtype), w_oihw.astype(operand_dtype),
      window_strides=(1, 1), padding="VALID", rhs_dilation=(rate, rate),
      dimension_numbers=("NCHW", "OIHW", "NCHW"),
      preferred_element_type=jnp.float32)
  return y + b.reshape(1, -1, 1, 1)


def aot_block_nf_reference(x, params, operand_dtype=jnp.float32):
  outs = []
  for i, r in enumerate(RATES):
    w = standardize_weight(params[f"block{i}_w"], params[f"block{i}_gain"])
    xp = jnp.pad(x, ((0, 0), (0, 0), (r, r), (r, r)), mode="reflect")
    y = _conv_ref(xp, w, params[f"block{i}_b"], r, operand_dtype)
    outs.append(jax.nn.gelu(y, approximate=False) * GELU_SCALE)
  cat = jnp.concatenate(outs, axis=1)
  wf = standardize_weight(params["fuse_w"], params["fuse_gain"])
  out = _conv_ref(jnp.pad(cat, ((0, 0), (0, 0), (1, 1), (1, 1)), mode="reflect"),
                  wf, params["fuse_b"], 1, operand_dtype)
  wg = standardize_weight(params["gate_w"], params["gate_gain"])
  g = _conv_ref(jnp.pad(x, ((0, 0), (0, 0), (1, 1), (1, 1)), mode="reflect"),
                wg, params["gate_b"], 1, operand_dtype)
  mean = g.mean(axis=(2, 3), keepdims=True)
  std = jnp.std(g, axis=(2, 3), keepdims=True, ddof=1) + 1e-9
  mask = jax.nn.sigmoid(5.0 * (2.0 * (g - mean) / std))
  return (x * (1.0 - mask) + out * mask) * 1.09


# ---------------------------------------------------------------------------
if __name__ == "__main__":
  # ReflectionPad2d(16) (largest rate) requires spatial > 16.
  N, DIM, H, W = 2, 16, 20, 20

  key = jax.random.PRNGKey(0)
  k_x, k_p = jax.random.split(key)
  x = jax.random.normal(k_x, (N, DIM, H, W), jnp.float32)   # NCHW, like PyTorch
  params = init_params(k_p, DIM)

  prep = prepare_params(params, DIM)    # constants: hoisted out of the hot path
  y = jax.jit(aot_block_nf_forward)(x, prep)
  y = jax.block_until_ready(y)

  # Correctness:
  #  (1) tight check vs a reference with the same bf16 rounding of the conv
  #      operands (validates kernels / im2col / fusion exactly);
  #  (2) loose sanity check vs exact-f32 module semantics (bf16 operands with
  #      f32 accumulation stay within a few percent through the 10x gate).
  y_bf16 = aot_block_nf_reference(x, params, operand_dtype=jnp.bfloat16)
  y_f32 = aot_block_nf_reference(x, params, operand_dtype=jnp.float32)
  err_bf16 = float(jnp.max(jnp.abs(y - y_bf16)))
  err_f32 = float(jnp.max(jnp.abs(y - y_f32)))
  assert err_bf16 < 5e-3, f"mismatch vs bf16-matched reference: {err_bf16}"
  assert err_f32 < 1.5e-1, f"mismatch vs exact f32 reference: {err_f32}"
  print("KERNEL_OK")
</pallas_src>

<mosaic_0001>
module attributes {stable_mosaic.version = 11 : i64} {
  func.func @_branch_cat_kernel(%arg0: i32, %arg1: memref<1x576x400xbf16, #tpu.memory_space<vmem>>, %arg2: memref<16x576xbf16, #tpu.memory_space<vmem>>, %arg3: memref<16x1xf32, #tpu.memory_space<vmem>>, %arg4: memref<1x16x400xf32, #tpu.memory_space<vmem>>) attributes {dimension_semantics = [#tpu.dimension_semantics<parallel>], iteration_bounds = array<i64: 2>, scalar_prefetch = 0 : i64, scratch_operands = 0 : i64, tpu.core_type = #tpu.core_type<tc>, window_params = [{transform_indices = @transform_0, window_bounds = array<i64: 1, 576, 400>}, {pipeline_mode = #tpu.pipeline_mode<synchronous>, transform_indices = @transform_1, window_bounds = array<i64: 16, 576>}, {pipeline_mode = #tpu.pipeline_mode<synchronous>, transform_indices = @transform_2, window_bounds = array<i64: 16, 1>}, {transform_indices = @transform_3, window_bounds = array<i64: 1, 16, 400>}]} {
    %c0 = arith.constant 0 : index
    %c0_0 = arith.constant 0 : index
    %0 = vector.load %arg2[%c0, %c0_0] : memref<16x576xbf16, #tpu.memory_space<vmem>>, vector<16x576xbf16>
    %c0_1 = arith.constant 0 : index
    %c0_2 = arith.constant 0 : index
    %c0_3 = arith.constant 0 : index
    %1 = vector.load %arg1[%c0_1, %c0_2, %c0_3] : memref<1x576x400xbf16, #tpu.memory_space<vmem>>, vector<1x576x400xbf16>
    %2 = vector.shape_cast %1 : vector<1x576x400xbf16> to vector<576x400xbf16>
    %cst = arith.constant dense<0.000000e+00> : vector<16x400xf32>
    %3 = tpu.matmul %0, %2, %cst {dimension_numbers = #tpu.dot_dimension_numbers<[1], [0], [0], [1], [0, 0, 1, 1], [], []>} : vector<16x576xbf16>, vector<576x400xbf16>, vector<16x400xf32> -> vector<16x400xf32>
    %c0_4 = arith.constant 0 : index
    %c0_5 = arith.constant 0 : index
    %4 = vector.load %arg3[%c0_4, %c0_5] : memref<16x1xf32, #tpu.memory_space<vmem>>, vector<16x1xf32>
    %5 = vector.broadcast %4 : vector<16x1xf32> to vector<16x400xf32>
    %6 = arith.addf %3, %5 : vector<16x400xf32>
    %cst_6 = arith.constant 5.000000e-01 : f32
    %7 = vector.broadcast %cst_6 : f32 to vector<16x400xf32>
    %8 = arith.mulf %7, %6 : vector<16x400xf32>
    %cst_7 = arith.constant 0.707106769 : f32
    %9 = vector.broadcast %cst_7 : f32 to vector<16x400xf32>
    %10 = arith.mulf %6, %9 : vector<16x400xf32>
    %11 = math.erf %10 : vector<16x400xf32>
    %cst_8 = arith.constant 1.000000e+00 : f32
    %12 = vector.broadcast %cst_8 : f32 to vector<16x400xf32>
    %13 = arith.addf %12, %11 : vector<16x400xf32>
    %14 = arith.mulf %8, %13 : vector<16x400xf32>
    %cst_9 = arith.constant 1.70150435 : f32
    %15 = vector.broadcast %cst_9 : f32 to vector<16x400xf32>
    %16 = arith.mulf %14, %15 : vector<16x400xf32>
    %c0_10 = arith.constant 0 : index
    %c0_11 = arith.constant 0 : index
    %c0_12 = arith.constant 0 : index
    %17 = vector.load %arg4[%c0_10, %c0_11, %c0_12] : memref<1x16x400xf32, #tpu.memory_space<vmem>>, vector<1x16x400xf32>
    %18 = vector.shape_cast %17 : vector<1x16x400xf32> to vector<16x400xf32>
    %19 = vector.shape_cast %16 : vector<16x400xf32> to vector<1x16x400xf32>
    tpu.vector_store %arg4[%c0_10, %c0_11, %c0_12], %19 {strides = array<i32>} : memref<1x16x400xf32, #tpu.memory_space<vmem>>, vector<1x16x400xf32>,
    return
  }
  func.func @transform_0(%arg0: i32) -> (i32, i32, i32) {
    %c0_i32 = arith.constant 0 : i32
    %c0_i32_0 = arith.constant 0 : i32
    %c0_i32_1 = arith.constant 0 : i32
    return %arg0, %c0_i32, %c0_i32_0 : i32, i32, i32
  }
  func.func @transform_1(%arg0: i32) -> (i32, i32) {
    %c0_i32 = arith.constant 0 : i32
    %c0_i32_0 = arith.constant 0 : i32
    %c0_i32_1 = arith.constant 0 : i32
    return %c0_i32, %c0_i32_0 : i32, i32
  }
  func.func @transform_2(%arg0: i32) -> (i32, i32) {
    %c0_i32 = arith.constant 0 : i32
    %c0_i32_0 = arith.constant 0 : i32
    %c0_i32_1 = arith.constant 0 : i32
    return %c0_i32, %c0_i32_0 : i32, i32
  }
  func.func @transform_3(%arg0: i32) -> (i32, i32, i32) {
    %c0_i32 = arith.constant 0 : i32
    %c0_i32_0 = arith.constant 0 : i32
    %c0_i32_1 = arith.constant 0 : i32
    return %arg0, %c0_i32, %c0_i32_0 : i32, i32, i32
  }
}

module attributes {stable_mosaic.version = 11 : i64} {
  func.func @_fuse_gate_blend_kernel(%arg0: i32, %arg1: memref<1x144x400xbf16, #tpu.memory_space<vmem>>, %arg2: memref<1x144x400xbf16, #tpu.memory_space<vmem>>, %arg3: memref<1x16x400xf32, #tpu.memory_space<vmem>>, %arg4: memref<16x144xbf16, #tpu.memory_space<vmem>>, %arg5: memref<16x144xbf16, #tpu.memory_space<vmem>>, %arg6: memref<16x1xf32, #tpu.memory_space<vmem>>, %arg7: memref<16x1xf32, #tpu.memory_space<vmem>>, %arg8: memref<1x16x400xf32, #tpu.memory_space<vmem>>) attributes {dimension_semantics = [#tpu.dimension_semantics<parallel>], iteration_bounds = array<i64: 2>, scalar_prefetch = 0 : i64, scratch_operands = 0 : i64, tpu.core_type = #tpu.core_type<tc>, window_params = [{transform_indices = @transform_0, window_bounds = array<i64: 1, 144, 400>}, {transform_indices = @transform_1, window_bounds = array<i64: 1, 144, 400>}, {transform_indices = @transform_2, window_bounds = array<i64: 1, 16, 400>}, {pipeline_mode = #tpu.pipeline_mode<synchronous>, transform_indices = @transform_3, window_bounds = array<i64: 16, 144>}, {pipeline_mode = #tpu.pipeline_mode<synchronous>, transform_indices = @transform_4, window_bounds = array<i64: 16, 144>}, {pipeline_mode = #tpu.pipeline_mode<synchronous>, transform_indices = @transform_5, window_bounds = array<i64: 16, 1>}, {pipeline_mode = #tpu.pipeline_mode<synchronous>, transform_indices = @transform_6, window_bounds = array<i64: 16, 1>}, {transform_indices = @transform_7, window_bounds = array<i64: 1, 16, 400>}]} {
    %c0 = arith.constant 0 : index
    %c0_0 = arith.constant 0 : index
    %0 = vector.load %arg4[%c0, %c0_0] : memref<16x144xbf16, #tpu.memory_space<vmem>>, vector<16x144xbf16>
    %c0_1 = arith.constant 0 : index
    %c0_2 = arith.constant 0 : index
    %c0_3 = arith.constant 0 : index
    %1 = vector.load %arg1[%c0_1, %c0_2, %c0_3] : memref<1x144x400xbf16, #tpu.memory_space<vmem>>, vector<1x144x400xbf16>
    %2 = vector.shape_cast %1 : vector<1x144x400xbf16> to vector<144x400xbf16>
    %cst = arith.constant dense<0.000000e+00> : vector<16x400xf32>
    %3 = tpu.matmul %0, %2, %cst {dimension_numbers = #tpu.dot_dimension_numbers<[1], [0], [0], [1], [0, 0, 1, 1], [], []>} : vector<16x144xbf16>, vector<144x400xbf16>, vector<16x400xf32> -> vector<16x400xf32>
    %c0_4 = arith.constant 0 : index
    %c0_5 = arith.constant 0 : index
    %4 = vector.load %arg6[%c0_4, %c0_5] : memref<16x1xf32, #tpu.memory_space<vmem>>, vector<16x1xf32>
    %5 = vector.broadcast %4 : vector<16x1xf32> to vector<16x400xf32>
    %6 = arith.addf %3, %5 : vector<16x400xf32>
    %c0_6 = arith.constant 0 : index
    %c0_7 = arith.constant 0 : index
    %7 = vector.load %arg5[%c0_6, %c0_7] : memref<16x144xbf16, #tpu.memory_space<vmem>>, vector<16x144xbf16>
    %c0_8 = arith.constant 0 : index
    %c0_9 = arith.constant 0 : index
    %c0_10 = arith.constant 0 : index
    %8 = vector.load %arg2[%c0_8, %c0_9, %c0_10] : memref<1x144x400xbf16, #tpu.memory_space<vmem>>, vector<1x144x400xbf16>
    %9 = vector.shape_cast %8 : vector<1x144x400xbf16> to vector<144x400xbf16>
    %cst_11 = arith.constant dense<0.000000e+00> : vector<16x400xf32>
    %10 = tpu.matmul %7, %9, %cst_11 {dimension_numbers = #tpu.dot_dimension_numbers<[1], [0], [0], [1], [0, 0, 1, 1], [], []>} : vector<16x144xbf16>, vector<144x400xbf16>, vector<16x400xf32> -> vector<16x400xf32>
    %c0_12 = arith.constant 0 : index
    %c0_13 = arith.constant 0 : index
    %11 = vector.load %arg7[%c0_12, %c0_13] : memref<16x1xf32, #tpu.memory_space<vmem>>, vector<16x1xf32>
    %12 = vector.broadcast %11 : vector<16x1xf32> to vector<16x400xf32>
    %13 = arith.addf %10, %12 : vector<16x400xf32>
    %cst_14 = arith.constant dense<0.000000e+00> : vector<16xf32>
    %14 = vector.multi_reduction <add>, %13, %cst_14 [1] : vector<16x400xf32> to vector<16xf32>
    %15 = vector.shape_cast %14 : vector<16xf32> to vector<16x1xf32>
    %cst_15 = arith.constant 4.000000e+02 : f32
    %16 = vector.broadcast %cst_15 : f32 to vector<16x1xf32>
    %17 = arith.divf %15, %16 : vector<16x1xf32>
    %18 = vector.broadcast %17 : vector<16x1xf32> to vector<16x400xf32>
    %19 = arith.subf %13, %18 : vector<16x400xf32>
    %20 = arith.mulf %19, %19 : vector<16x400xf32>
    %cst_16 = arith.constant dense<0.000000e+00> : vector<16xf32>
    %21 = vector.multi_reduction <add>, %20, %cst_16 [1] : vector<16x400xf32> to vector<16xf32>
    %22 = vector.shape_cast %21 : vector<16xf32> to vector<16x1xf32>
    %cst_17 = arith.constant 0.00250626565 : f32
    %23 = vector.broadcast %cst_17 : f32 to vector<16x1xf32>
    %24 = arith.mulf %22, %23 : vector<16x1xf32>
    %25 = math.sqrt %24 : vector<16x1xf32>
    %cst_18 = arith.constant 9.99999971E-10 : f32
    %26 = vector.broadcast %cst_18 : f32 to vector<16x1xf32>
    %27 = arith.addf %25, %26 : vector<16x1xf32>
    %28 = vector.broadcast %17 : vector<16x1xf32> to vector<16x400xf32>
    %29 = arith.subf %13, %28 : vector<16x400xf32>
    %cst_19 = arith.constant 1.000000e+01 : f32
    %30 = vector.broadcast %cst_19 : f32 to vector<16x400xf32>
    %31 = arith.mulf %30, %29 : vector<16x400xf32>
    %32 = vector.broadcast %27 : vector<16x1xf32> to vector<16x400xf32>
    %33 = arith.divf %31, %32 : vector<16x400xf32>
    %34 = arith.negf %33 : vector<16x400xf32>
    %35 = math.exp %34 : vector<16x400xf32>
    %cst_20 = arith.constant 1.000000e+00 : f32
    %36 = vector.broadcast %cst_20 : f32 to vector<16x400xf32>
    %37 = arith.addf %36, %35 : vector<16x400xf32>
    %38 = arith.divf %36, %37 : vector<16x400xf32>
    %c0_21 = arith.constant 0 : index
    %c0_22 = arith.constant 0 : index
    %c0_23 = arith.constant 0 : index
    %39 = vector.load %arg3[%c0_21, %c0_22, %c0_23] : memref<1x16x400xf32, #tpu.memory_space<vmem>>, vector<1x16x400xf32>
    %40 = vector.shape_cast %39 : vector<1x16x400xf32> to vector<16x400xf32>
    %cst_24 = arith.constant 1.000000e+00 : f32
    %41 = vector.broadcast %cst_24 : f32 to vector<16x400xf32>
    %42 = arith.subf %41, %38 : vector<16x400xf32>
    %43 = arith.mulf %40, %42 : vector<16x400xf32>
    %44 = arith.mulf %6, %38 : vector<16x400xf32>
    %45 = arith.addf %43, %44 : vector<16x400xf32>
    %cst_25 = arith.constant 1.090000e+00 : f32
    %46 = vector.broadcast %cst_25 : f32 to vector<16x400xf32>
    %47 = arith.mulf %45, %46 : vector<16x400xf32>
    %c0_26 = arith.constant 0 : index
    %c0_27 = arith.constant 0 : index
    %c0_28 = arith.constant 0 : index
    %48 = vector.load %arg8[%c0_26, %c0_27, %c0_28] : memref<1x16x400xf32, #tpu.memory_space<vmem>>, vector<1x16x400xf32>
    %49 = vector.shape_cast %48 : vector<1x16x400xf32> to vector<16x400xf32>
    %50 = vector.shape_cast %47 : vector<16x400xf32> to vector<1x16x400xf32>
    tpu.vector_store %arg8[%c0_26, %c0_27, %c0_28], %50 {strides = array<i32>} : memref<1x16x400xf32, #tpu.memory_space<vmem>>, vector<1x16x400xf32>,
    return
  }
  func.func @transform_0(%arg0: i32) -> (i32, i32, i32) {
    %c0_i32 = arith.constant 0 : i32
    %c0_i32_0 = arith.constant 0 : i32
    %c0_i32_1 = arith.constant 0 : i32
    return %arg0, %c0_i32, %c0_i32_0 : i32, i32, i32
  }
  func.func @transform_1(%arg0: i32) -> (i32, i32, i32) {
    %c0_i32 = arith.constant 0 : i32
    %c0_i32_0 = arith.constant 0 : i32
    %c0_i32_1 = arith.constant 0 : i32
    return %arg0, %c0_i32, %c0_i32_0 : i32, i32, i32
  }
  func.func @transform_2(%arg0: i32) -> (i32, i32, i32) {
    %c0_i32 = arith.constant 0 : i32
    %c0_i32_0 = arith.constant 0 : i32
    %c0_i32_1 = arith.constant 0 : i32
    return %arg0, %c0_i32, %c0_i32_0 : i32, i32, i32
  }
  func.func @transform_3(%arg0: i32) -> (i32, i32) {
    %c0_i32 = arith.constant 0 : i32
    %c0_i32_0 = arith.constant 0 : i32
    %c0_i32_1 = arith.constant 0 : i32
    return %c0_i32, %c0_i32_0 : i32, i32
  }
  func.func @transform_4(%arg0: i32) -> (i32, i32) {
    %c0_i32 = arith.constant 0 : i32
    %c0_i32_0 = arith.constant 0 : i32
    %c0_i32_1 = arith.constant 0 : i32
    return %c0_i32, %c0_i32_0 : i32, i32
  }
  func.func @transform_5(%arg0: i32) -> (i32, i32) {
    %c0_i32 = arith.constant 0 : i32
    %c0_i32_0 = arith.constant 0 : i32
    %c0_i32_1 = arith.constant 0 : i32
    return %c0_i32, %c0_i32_0 : i32, i32
  }
  func.func @transform_6(%arg0: i32) -> (i32, i32) {
    %c0_i32 = arith.constant 0 : i32
    %c0_i32_0 = arith.constant 0 : i32
    %c0_i32_1 = arith.constant 0 : i32
    return %c0_i32, %c0_i32_0 : i32, i32
  }
  func.func @transform_7(%arg0: i32) -> (i32, i32, i32) {
    %c0_i32 = arith.constant 0 : i32
    %c0_i32_0 = arith.constant 0 : i32
    %c0_i32_1 = arith.constant 0 : i32
    return %arg0, %c0_i32, %c0_i32_0 : i32, i32, i32
  }
}

</mosaic_0001>

<bundles_post_ra>
// kernel: aot_block_nf_forward.2
= control target key start
LH: loop header
LB: loop body
LE: loop exit
PB: predicated region body
PF: predicated region fallthrough
CT: control target
= control target key end

     0   :  { %s1894_s12 = smov 0   ;;  %s2129_s0 = inlined_call_operand.vmem [shape: bf16[2,576,400], index: 0, kind: input, shape index: {}]   ;;  %s2130_s1 = inlined_call_operand.vmem [shape: bf16[16,576], index: 1, kind: input, shape index: {}]   ;;  %s2131_s2 = inlined_call_operand.vmem [shape: f32[16,1], index: 2, kind: input, shape index: {}]   ;;  %s2132_s3 = inlined_call_operand.vmem [shape: f32[2,16,400], index: 3, kind: output, shape index: {}]  }
   0x1 LB: > { %s1453_s13 = sadd.s32 4294967295, %s1871_s12   ;;  %p1457_p0 = scmp.ge.s32.totalorder %s1871_s12, 1  ;;  %s1871_s12 = sphi %s1894_s12, %s13_s12  }
   0x2   : > { %p137_p1 = scmp.lt.s32.totalorder %s1871_s12, 3 }
   0x4   : > { %p138_p2 = pnand %p1457_p0, %p137_p1 }
   0x5   : > { %p161_p3 = scmp.lt.s32.totalorder (!%p138_p2), %s1453_s13, 1 }
   0x6   : > { %141 = sbr.rel (%p138_p2) target bundleno = 386 (0x182), region = 32 }
   0xb   : > { %v1905_v0 = vld [vmem:[%s2130_s1 + $0x4] ss:$20 sps:$4 sm:$0xff]   ;;  %v1873_v1 = vmov 0   ;;  %s2134_s13 = smov (!%p161_p3, %s1453_s13), 1  ;;  %v1913_v2 = vld [vmem:[%s2130_s1 + $0xc] ss:$20 sps:$4 sm:$0xff]  }
   0xc   : > { %1625 = vset.pattern.permute.xlu0 %v1873_v1  ;;  %1115 = vmatprep.mubr.bf16.mxu0 %v1905_v0  ;;  %s1615_s18 = smul.u32 1152, %s2134_s13  ;;  %vm1079_vm0 = vcmask 523264   ;;  %s1614_s5 = sshll.u32 %s2134_s13, 6  ;;  %vm1392_vm1 = vcmask 130048  }
   0xd   : > { %1158 = vmatprep.mubr.bf16.mxu1 %v1913_v2  ;;  %s2112_s8 = scalar_lea.vmem %s2132_s3, %s1614_s5 }
   0xe   : > { %s1921_s21 = scalar_lea.vmem %s2129_s0, %s1615_s18 }
   0xf   : > { %v1626_v3 = vld [vmem:[%s1921_s21 + $0xe4] ss:$16 sps:$4 sm:$0xff]   ;;  %v1630_v5 = vld [vmem:[%s1921_s21 + $0xe0] ss:$16 sps:$4 sm:$0xff]  }
  0x10   : > { %v1628_v4 = vld [vmem:[%s1921_s21 + $0x2e4] ss:$16 sps:$4 sm:$0xff]   ;;  %1083 = vmatprep.subr.bf16.mxu0 %v1626_v3  ;;  %v1631_v6 = vld [vmem:[%s1921_s21 + $0x2e0] ss:$16 sps:$4 sm:$0xff]  }
  0x11   : > { %1126 = vmatprep.subr.bf16.mxu1 %v1628_v4  ;;  %v1632_v7 = vld [vmem:[%s1921_s21 + $0xc4] ss:$16 sps:$4 sm:$0xff]   ;;  %1084 = vmatpush1.bf16.msra.mxu0 %v1630_v5  ;;  %v1636_v9 = vld [vmem:[%s1921_s21 + $0xc0] ss:$16 sps:$4 sm:$0xff]  }
  0x12   : > { %1127 = vmatpush1.bf16.msra.mxu1 %v1631_v6  ;;  %v1634_v8 = vld [vmem:[%s1921_s21 + $0x2c4] ss:$16 sps:$4 sm:$0xff]   ;;  %1085 = vmatprep.subr.bf16.mxu0 %v1632_v7  ;;  %v1637_v10 = vld [vmem:[%s1921_s21 + $0x2c0] ss:$16 sps:$4 sm:$0xff]   ;;  %v1733_v7 = vld [vmem:[%s1921_s21 + $0xec] ss:$16 sps:$4 sm:$0xff]  }
  0x13   : > { %1128 = vmatprep.subr.bf16.mxu1 %v1634_v8  ;;  %v1638_v11 = vld [vmem:[%s1921_s21 + $0xa4] ss:$16 sps:$4 sm:$0xff]   ;;  %v1642_v13 = vld [vmem:[%s1921_s21 + $0xa0] ss:$16 sps:$4 sm:$0xff]  }
  0x14   : > { %v1640_v12 = vld [vmem:[%s1921_s21 + $0x2a4] ss:$16 sps:$4 sm:$0xff]   ;;  %v1643_v14 = vld [vmem:[%s1921_s21 + $0x2a0] ss:$16 sps:$4 sm:$0xff]  }
  0x15   : > { %1086 = vmatpush1.bf16.msra.mxu0 %v1636_v9  ;;  %v1644_v15 = vld [vmem:[%s1921_s21 + $0x84] ss:$16 sps:$4 sm:$0xff]   ;;  %v1648_v17 = vld [vmem:[%s1921_s21 + $0x80] ss:$16 sps:$4 sm:$0xff]   ;;  %v1997_v9 = vld [vmem:[%s2130_s1 + $0x8] ss:$20 sps:$4 sm:$0xff]  }
  0x16   : > { %1129 = vmatpush1.bf16.msra.mxu1 %v1637_v10  ;;  %1087 = vmatprep.subr.bf16.mxu0 %v1638_v11  ;;  %v1646_v16 = vld [vmem:[%s1921_s21 + $0x284] ss:$16 sps:$4 sm:$0xff]   ;;  %v1649_v18 = vld [vmem:[%s1921_s21 + $0x280] ss:$16 sps:$4 sm:$0xff]   ;;  %v1731_v11 = vld [vmem:[%s1921_s21 + $0xe8] ss:$16 sps:$4 sm:$0xff]  }
  0x17   : > { %1130 = vmatprep.subr.bf16.mxu1 %v1640_v12  ;;  %v1650_v19 = vld [vmem:[%s1921_s21 + $0x64] ss:$16 sps:$4 sm:$0xff]   ;;  %v1654_v21 = vld [vmem:[%s1921_s21 + $0x60] ss:$16 sps:$4 sm:$0xff]  }
  0x18   : > { %v1652_v20 = vld [vmem:[%s1921_s21 + $0x264] ss:$16 sps:$4 sm:$0xff]   ;;  %v1655_v22 = vld [vmem:[%s1921_s21 + $0x260] ss:$16 sps:$4 sm:$0xff]  }
  0x19   : > { %1088 = vmatpush1.bf16.msra.mxu0 %v1642_v13  ;;  %v1656_v23 = vld [vmem:[%s1921_s21 + $0x44] ss:$16 sps:$4 sm:$0xff]   ;;  %v1660_v25 = vld [vmem:[%s1921_s21 + $0x40] ss:$16 sps:$4 sm:$0xff]   ;;  %v1739_v13 = vld [vmem:[%s1921_s21 + $0xcc] ss:$16 sps:$4 sm:$0xff]  }
  0x1a   : > { %1131 = vmatpush1.bf16.msra.mxu1 %v1643_v14  ;;  %1089 = vmatprep.subr.bf16.mxu0 %v1644_v15  ;;  %v1658_v24 = vld [vmem:[%s1921_s21 + $0x244] ss:$16 sps:$4 sm:$0xff]   ;;  %v1661_v26 = vld [vmem:[%s1921_s21 + $0x240] ss:$16 sps:$4 sm:$0xff]   ;;  %v1737_v15 = vld [vmem:[%s1921_s21 + $0xc8] ss:$16 sps:$4 sm:$0xff]  }
  0x1b   : > { %1132 = vmatprep.subr.bf16.mxu1 %v1646_v16  ;;  %v1662_v27 = vld [vmem:[%s1921_s21 + $0x24] ss:$16 sps:$4 sm:$0xff]   ;;  %v1666_v29 = vld [vmem:[%s1921_s21 + $0x20] ss:$16 sps:$4 sm:$0xff]  }
  0x1c   : > { %v1664_v28 = vld [vmem:[%s1921_s21 + $0x224] ss:$16 sps:$4 sm:$0xff]   ;;  %v1667_v30 = vld [vmem:[%s1921_s21 + $0x220] ss:$16 sps:$4 sm:$0xff]  }
  0x1d   : > { %1090 = vmatpush1.bf16.msra.mxu0 %v1648_v17  ;;  %v1668_v31 = vld [vmem:[%s1921_s21 + $0x4] ss:$16 sps:$4 sm:$0xff]   ;;  %v1672_v33 = vld [vmem:[%s1921_s21] ss:$16 sps:$4 sm:$0xff]   ;;  %v1745_v17 = vld [vmem:[%s1921_s21 + $0xac] ss:$16 sps:$4 sm:$0xff]  }
  0x1e   : > { %1133 = vmatpush1.bf16.msra.mxu1 %v1649_v18  ;;  %1091 = vmatprep.subr.bf16.mxu0 %v1650_v19  ;;  %v1670_v32 = vld [vmem:[%s1921_s21 + $0x204] ss:$16 sps:$4 sm:$0xff]   ;;  %v1673_v34 = vld [vmem:[%s1921_s21 + $0x200] ss:$16 sps:$4 sm:$0xff]   ;;  %v1743_v19 = vld [vmem:[%s1921_s21 + $0xa8] ss:$16 sps:$4 sm:$0xff]  }
  0x1f   : > { %1134 = vmatprep.subr.bf16.mxu1 %v1652_v20  ;;  %v1674_v35 = vld [vmem:[%s1921_s21 + $0x1e4] ss:$16 sps:$4 sm:$0xff]   ;;  %v1678_v37 = vld [vmem:[%s1921_s21 + $0x1e0] ss:$16 sps:$4 sm:$0xff]  }
  0x20   : > { %v1676_v36 = vld [vmem:[%s1921_s21 + $0x3e4] ss:$16 sps:$4 sm:$0xff]   ;;  %v1679_v38 = vld [vmem:[%s1921_s21 + $0x3e0] ss:$16 sps:$4 sm:$0xff]  }
  0x21   : > { %1092 = vmatpush1.bf16.msra.mxu0 %v1654_v21  ;;  %v1680_v39 = vld [vmem:[%s1921_s21 + $0x1c4] ss:$16 sps:$4 sm:$0xff]   ;;  %v1684_v41 = vld [vmem:[%s1921_s21 + $0x1c0] ss:$16 sps:$4 sm:$0xff]   ;;  %v1751_v21 = vld [vmem:[%s1921_s21 + $0x8c] ss:$16 sps:$4 sm:$0xff]  }
  0x22   : > { %1135 = vmatpush1.bf16.msra.mxu1 %v1655_v22  ;;  %1093 = vmatprep.subr.bf16.mxu0 %v1656_v23  ;;  %v1682_v40 = vld [vmem:[%s1921_s21 + $0x3c4] ss:$16 sps:$4 sm:$0xff]   ;;  %v1685_v42 = vld [vmem:[%s1921_s21 + $0x3c0] ss:$16 sps:$4 sm:$0xff]   ;;  %v1749_v23 = vld [vmem:[%s1921_s21 + $0x88] ss:$16 sps:$4 sm:$0xff]  }
  0x23   : > { %1136 = vmatprep.subr.bf16.mxu1 %v1658_v24  ;;  %v1686_v43 = vld [vmem:[%s1921_s21 + $0x1a4] ss:$16 sps:$4 sm:$0xff]   ;;  %v1690_v45 = vld [vmem:[%s1921_s21 + $0x1a0] ss:$16 sps:$4 sm:$0xff]   ;;  %v1755_v24 = vld [vmem:[%s1921_s21 + $0x6c] ss:$16 sps:$4 sm:$0xff]  }
  0x24   : > { %v1688_v44 = vld [vmem:[%s1921_s21 + $0x3a4] ss:$16 sps:$4 sm:$0xff]   ;;  %v1691_v46 = vld [vmem:[%s1921_s21 + $0x3a0] ss:$16 sps:$4 sm:$0xff]  }
  0x25   : > { %1094 = vmatpush1.bf16.msra.mxu0 %v1660_v25  ;;  %v1692_v47 = vld [vmem:[%s1921_s21 + $0x184] ss:$16 sps:$4 sm:$0xff]   ;;  %v1696_v49 = vld [vmem:[%s1921_s21 + $0x180] ss:$16 sps:$4 sm:$0xff]  }
  0x26   : > { %1137 = vmatpush1.bf16.msra.mxu1 %v1661_v26  ;;  %1095 = vmatprep.subr.bf16.mxu0 %v1662_v27  ;;  %v1694_v48 = vld [vmem:[%s1921_s21 + $0x384] ss:$16 sps:$4 sm:$0xff]   ;;  %v1697_v50 = vld [vmem:[%s1921_s21 + $0x380] ss:$16 sps:$4 sm:$0xff]   ;;  %v1753_v26 = vld [vmem:[%s1921_s21 + $0x68] ss:$16 sps:$4 sm:$0xff]  }
  0x27   : > { %1138 = vmatprep.subr.bf16.mxu1 %v1664_v28  ;;  %v1698_v51 = vld [vmem:[%s1921_s21 + $0x164] ss:$16 sps:$4 sm:$0xff]   ;;  %v1702_v53 = vld [vmem:[%s1921_s21 + $0x160] ss:$16 sps:$4 sm:$0xff]   ;;  %v1756_v27 = vld [vmem:[%s1921_s21 + $0x2e8] ss:$16 sps:$4 sm:$0xff]  }
  0x28   : > { %v1700_v52 = vld [vmem:[%s1921_s21 + $0x364] ss:$16 sps:$4 sm:$0xff]   ;;  %v1703_v54 = vld [vmem:[%s1921_s21 + $0x360] ss:$16 sps:$4 sm:$0xff]   ;;  %v1761_v28 = vld [vmem:[%s1921_s21 + $0x4c] ss:$16 sps:$4 sm:$0xff]  }
  0x29   : > { %1096 = vmatpush1.bf16.msra.mxu0 %v1666_v29  ;;  %v1704_v55 = vld [vmem:[%s1921_s21 + $0x144] ss:$16 sps:$4 sm:$0xff]   ;;  %v1708_v57 = vld [vmem:[%s1921_s21 + $0x140] ss:$16 sps:$4 sm:$0xff]   ;;  %v1764_v29 = vld [vmem:[%s1921_s21 + $0x2cc] ss:$16 sps:$4 sm:$0xff]  }
  0x2a   : > { %1139 = vmatpush1.bf16.msra.mxu1 %v1667_v30  ;;  %1097 = vmatprep.subr.bf16.mxu0 %v1668_v31  ;;  %v1706_v56 = vld [vmem:[%s1921_s21 + $0x344] ss:$16 sps:$4 sm:$0xff]   ;;  %v1709_v58 = vld [vmem:[%s1921_s21 + $0x340] ss:$16 sps:$4 sm:$0xff]   ;;  %v1759_v30 = vld [vmem:[%s1921_s21 + $0x48] ss:$16 sps:$4 sm:$0xff]  }
  0x2b   : > { %1140 = vmatprep.subr.bf16.mxu1 %v1670_v32  ;;  %v1710_v59 = vld [vmem:[%s1921_s21 + $0x124] ss:$16 sps:$4 sm:$0xff]   ;;  %v1714_v61 = vld [vmem:[%s1921_s21 + $0x120] ss:$16 sps:$4 sm:$0xff]   ;;  %v1762_v31 = vld [vmem:[%s1921_s21 + $0x2c8] ss:$16 sps:$4 sm:$0xff]  }
  0x2c   : > { %v1712_v60 = vld [vmem:[%s1921_s21 + $0x324] ss:$16 sps:$4 sm:$0xff]   ;;  %v1715_v62 = vld [vmem:[%s1921_s21 + $0x320] ss:$16 sps:$4 sm:$0xff]   ;;  %v1767_v32 = vld [vmem:[%s1921_s21 + $0x2c] ss:$16 sps:$4 sm:$0xff]  }
  0x2d   : > { %1098 = vmatpush1.bf16.msra.mxu0 %v1672_v33  ;;  %v1716_v63 = vld [vmem:[%s1921_s21 + $0x104] ss:$16 sps:$4 sm:$0xff]   ;;  %v1720_v4 = vld [vmem:[%s1921_s21 + $0x100] ss:$16 sps:$4 sm:$0xff]   ;;  %v1770_v33 = vld [vmem:[%s1921_s21 + $0x2ac] ss:$16 sps:$4 sm:$0xff]  }
  0x2e   : > { %1141 = vmatpush1.bf16.msra.mxu1 %v1673_v34  ;;  %1099 = vmatprep.subr.bf16.mxu0 %v1674_v35  ;;  %v1718_v3 = vld [vmem:[%s1921_s21 + $0x304] ss:$16 sps:$4 sm:$0xff]   ;;  %v1721_v5 = vld [vmem:[%s1921_s21 + $0x300] ss:$16 sps:$4 sm:$0xff]   ;;  %v1765_v34 = vld [vmem:[%s1921_s21 + $0x28] ss:$16 sps:$4 sm:$0xff]  }
  0x2f   : > { %1142 = vmatprep.subr.bf16.mxu1 %v1676_v36  ;;  %v1730_v6 = vld [vmem:[%s1921_s21 + $0x464] ss:$16 sps:$4 sm:$0xff]   ;;  %v1728_v10 = vld [vmem:[%s1921_s21 + $0x460] ss:$16 sps:$4 sm:$0xff]   ;;  %v1768_v35 = vld [vmem:[%s1921_s21 + $0x2a8] ss:$16 sps:$4 sm:$0xff]  }
  0x30   : > { %v1992_v8 = vld [vmem:[%s2130_s1] ss:$20 sps:$4 sm:$0xff]   ;;  %v2022_v25 = vld [vmem:[%s2130_s1 + $0x10] ss:$20 sps:$4 sm:$0xff]   ;;  %v1773_v36 = vld [vmem:[%s1921_s21 + $0xc] ss:$16 sps:$4 sm:$0xff]  }
  0x31   : > { %1100 = vmatpush2.bf16.msra.mxu0 %v1678_v37  ;;  %v1736_v12 = vld [vmem:[%s1921_s21 + $0x444] ss:$16 sps:$4 sm:$0xff]   ;;  %v1734_v14 = vld [vmem:[%s1921_s21 + $0x440] ss:$16 sps:$4 sm:$0xff]   ;;  %v1776_v37 = vld [vmem:[%s1921_s21 + $0x28c] ss:$16 sps:$4 sm:$0xff]  }
  0x32   : > { %1143 = vmatpush2.bf16.msra.mxu1 %v1679_v38  ;;  %1101 = vmatprep.subr.bf16.mxu0 %v1680_v39  ;;  %v1742_v16 = vld [vmem:[%s1921_s21 + $0x424] ss:$16 sps:$4 sm:$0xff]   ;;  %v1740_v18 = vld [vmem:[%s1921_s21 + $0x420] ss:$16 sps:$4 sm:$0xff]   ;;  %v1771_v39 = vld [vmem:[%s1921_s21 + $0x8] ss:$16 sps:$4 sm:$0xff]  }
  0x33   : > { %1144 = vmatprep.subr.bf16.mxu1 %v1682_v40  ;;  %v1748_v20 = vld [vmem:[%s1921_s21 + $0x404] ss:$16 sps:$4 sm:$0xff]   ;;  %v1746_v22 = vld [vmem:[%s1921_s21 + $0x400] ss:$16 sps:$4 sm:$0xff]   ;;  %v1779_v40 = vld [vmem:[%s1921_s21 + $0x1ec] ss:$16 sps:$4 sm:$0xff]  }
  0x34   : > { %v322_v38 = vld [vmem:[%s2131_s2] sm:$0xff] }
  0x35   : > { %1102 = vmatpush2.bf16.msra.mxu0 %v1684_v41  ;;  %326 = vperm.xlu0 %1625, %v322_v38   ;;  %v1782_v41 = vld [vmem:[%s1921_s21 + $0x26c] ss:$16 sps:$4 sm:$0xff]  }
  0x36   : > { %1145 = vmatpush2.bf16.msra.mxu1 %v1685_v42  ;;  %1103 = vmatprep.subr.bf16.mxu0 %v1686_v43  ;;  %v323_v42 = vld [vmem:[%s2131_s2 + $0x8] sm:$0xff] }
  0x37   : > { %1146 = vmatprep.subr.bf16.mxu1 %v1688_v44  ;;  %v1777_v43 = vld [vmem:[%s1921_s21 + $0x1e8] ss:$16 sps:$4 sm:$0xff]  }
  0x38   : > { %v1780_v44 = vld [vmem:[%s1921_s21 + $0x268] ss:$16 sps:$4 sm:$0xff]  }
  0x39   : > { %1104 = vmatpush2.bf16.msra.mxu0 %v1690_v45  ;;  %331 = vperm.xlu0 %1625, %v323_v42   ;;  %v1785_v45 = vld [vmem:[%s1921_s21 + $0x1cc] ss:$16 sps:$4 sm:$0xff]  }
  0x3a   : > { %1147 = vmatpush2.bf16.msra.mxu1 %v1691_v46  ;;  %1105 = vmatprep.subr.bf16.mxu0 %v1692_v47  ;;  %v1788_v46 = vld [vmem:[%s1921_s21 + $0x24c] ss:$16 sps:$4 sm:$0xff]   ;;  %v1783_v47 = vld [vmem:[%s1921_s21 + $0x1c8] ss:$16 sps:$4 sm:$0xff]  }
  0x3b   : > { %1148 = vmatprep.subr.bf16.mxu1 %v1694_v48  ;;  %v1786_v48 = vld [vmem:[%s1921_s21 + $0x248] ss:$16 sps:$4 sm:$0xff]  }
  0x3d   : > { %1106 = vmatpush2.bf16.msra.mxu0 %v1696_v49  ;;  %v1791_v49 = vld [vmem:[%s1921_s21 + $0x1ac] ss:$16 sps:$4 sm:$0xff]  }
  0x3e   : > { %1149 = vmatpush2.bf16.msra.mxu1 %v1697_v50  ;;  %1107 = vmatprep.subr.bf16.mxu0 %v1698_v51  ;;  %v1794_v50 = vld [vmem:[%s1921_s21 + $0x22c] ss:$16 sps:$4 sm:$0xff]   ;;  %v1789_v51 = vld [vmem:[%s1921_s21 + $0x1a8] ss:$16 sps:$4 sm:$0xff]  }
  0x3f   : > { %1150 = vmatprep.subr.bf16.mxu1 %v1700_v52  ;;  %v1792_v52 = vld [vmem:[%s1921_s21 + $0x228] ss:$16 sps:$4 sm:$0xff]  }
  0x41   : > { %1108 = vmatpush2.bf16.msra.mxu0 %v1702_v53  ;;  %v1797_v53 = vld [vmem:[%s1921_s21 + $0x18c] ss:$16 sps:$4 sm:$0xff]  }
  0x42   : > { %1151 = vmatpush2.bf16.msra.mxu1 %v1703_v54  ;;  %1109 = vmatprep.subr.bf16.mxu0 %v1704_v55  ;;  %v1800_v54 = vld [vmem:[%s1921_s21 + $0x20c] ss:$16 sps:$4 sm:$0xff]   ;;  %v1795_v55 = vld [vmem:[%s1921_s21 + $0x188] ss:$16 sps:$4 sm:$0xff]  }
  0x43   : > { %1152 = vmatprep.subr.bf16.mxu1 %v1706_v56  ;;  %v1798_v56 = vld [vmem:[%s1921_s21 + $0x208] ss:$16 sps:$4 sm:$0xff]  }
  0x45   : > { %1110 = vmatpush2.bf16.msra.mxu0 %v1708_v57  ;;  %v1803_v57 = vld [vmem:[%s1921_s21 + $0x16c] ss:$16 sps:$4 sm:$0xff]  }
  0x46   : > { %1153 = vmatpush2.bf16.msra.mxu1 %v1709_v58  ;;  %1111 = vmatprep.subr.bf16.mxu0 %v1710_v59  ;;  %v1806_v58 = vld [vmem:[%s1921_s21 + $0x3ec] ss:$16 sps:$4 sm:$0xff]   ;;  %v1801_v59 = vld [vmem:[%s1921_s21 + $0x168] ss:$16 sps:$4 sm:$0xff]  }
  0x47   : > { %1154 = vmatprep.subr.bf16.mxu1 %v1712_v60  ;;  %v1804_v60 = vld [vmem:[%s1921_s21 + $0x3e8] ss:$16 sps:$4 sm:$0xff]  }
  0x49   : > { %1112 = vmatpush2.bf16.msra.mxu0 %v1714_v61  ;;  %v1809_v61 = vld [vmem:[%s1921_s21 + $0x14c] ss:$16 sps:$4 sm:$0xff]  }
  0x4a   : > { %1155 = vmatpush2.bf16.msra.mxu1 %v1715_v62  ;;  %1113 = vmatprep.subr.bf16.mxu0 %v1716_v63  ;;  %v1812_v62 = vld [vmem:[%s1921_s21 + $0x3cc] ss:$16 sps:$4 sm:$0xff]   ;;  %v1807_v63 = vld [vmem:[%s1921_s21 + $0x148] ss:$16 sps:$4 sm:$0xff]  }
  0x4b   : > { %1156 = vmatprep.subr.bf16.mxu1 %v1718_v3  ;;  %v1810_v3 = vld [vmem:[%s1921_s21 + $0x3c8] ss:$16 sps:$4 sm:$0xff]  }
  0x4d   : > { %1114 = vmatpush2.bf16.msra.mxu0 %v1720_v4  ;;  %v1815_v4 = vld [vmem:[%s1921_s21 + $0x12c] ss:$16 sps:$4 sm:$0xff]  }
  0x4e   : > { %1157 = vmatpush2.bf16.msra.mxu1 %v1721_v5  ;;  %1177 = vmatprep.subr.bf16.mxu0 %v1730_v6  ;;  %v1818_v5 = vld [vmem:[%s1921_s21 + $0x3ac] ss:$16 sps:$4 sm:$0xff]   ;;  %v1813_v6 = vld [vmem:[%s1921_s21 + $0x128] ss:$16 sps:$4 sm:$0xff]  }
  0x4f   : > { %1212 = vmatprep.subr.bf16.mxu1 %v1733_v7  ;;  %v1816_v7 = vld [vmem:[%s1921_s21 + $0x3a8] ss:$16 sps:$4 sm:$0xff]  }
  0x50   : > { %1116 = vmatmul.mubr.bf16.vlgmr.msra.gmra.mxu0 %v1992_v8 }
  0x51   : > { %1159 = vmatmul.mubr.bf16.vlgmr.msra.gmra.mxu1 %v1997_v9  ;;  %1178 = vmatpush1.bf16.msra.mxu0 %v1728_v10  ;;  %v1821_v10 = vld [vmem:[%s1921_s21 + $0x10c] ss:$16 sps:$4 sm:$0xff]  }
  0x52   : > { %1213 = vmatpush1.bf16.msra.mxu1 %v1731_v11  ;;  %1179 = vmatprep.subr.bf16.mxu0 %v1736_v12  ;;  %v1824_v11 = vld [vmem:[%s1921_s21 + $0x38c] ss:$16 sps:$4 sm:$0xff]   ;;  %v1819_v12 = vld [vmem:[%s1921_s21 + $0x108] ss:$16 sps:$4 sm:$0xff]  }
  0x53   : > { %1214 = vmatprep.subr.bf16.mxu1 %v1739_v13  ;;  %1201 = vmatprep.mubr.bf16.mxu0 %v1873_v1  ;;  %v1822_v13 = vld [vmem:[%s1921_s21 + $0x388] ss:$16 sps:$4 sm:$0xff]  }
  0x54   : > { %1244 = vmatprep.mubr.bf16.mxu1 %v1905_v0  ;;  %v1758_v0 = vld [vmem:[%s1921_s21 + $0x2ec] ss:$16 sps:$4 sm:$0xff]  }
  0x55   : > { %1180 = vmatpush1.bf16.msra.mxu0 %v1734_v14  ;;  %v1827_v14 = vld [vmem:[%s1921_s21 + $0x36c] ss:$16 sps:$4 sm:$0xff]  }
  0x56   : > { %1215 = vmatpush1.bf16.msra.mxu1 %v1737_v15  ;;  %1181 = vmatprep.subr.bf16.mxu0 %v1742_v16  ;;  %v1830_v15 = vld [vmem:[%s1921_s21 + $0x46c] ss:$16 sps:$4 sm:$0xff]   ;;  %v1825_v16 = vld [vmem:[%s1921_s21 + $0x368] ss:$16 sps:$4 sm:$0xff]  }
  0x57   : > { %1216 = vmatprep.subr.bf16.mxu1 %v1745_v17  ;;  %v1828_v17 = vld [vmem:[%s1921_s21 + $0x468] ss:$16 sps:$4 sm:$0xff]  }
  0x59   : > { %1182 = vmatpush1.bf16.msra.mxu0 %v1740_v18  ;;  %v1833_v18 = vld [vmem:[%s1921_s21 + $0x34c] ss:$16 sps:$4 sm:$0xff]  }
  0x5a   : > { %1217 = vmatpush1.bf16.msra.mxu1 %v1743_v19  ;;  %1183 = vmatprep.subr.bf16.mxu0 %v1748_v20  ;;  %v1836_v19 = vld [vmem:[%s1921_s21 + $0x44c] ss:$16 sps:$4 sm:$0xff]   ;;  %v1831_v20 = vld [vmem:[%s1921_s21 + $0x348] ss:$16 sps:$4 sm:$0xff]  }
  0x5b   : > { %1218 = vmatprep.subr.bf16.mxu1 %v1751_v21  ;;  %v1834_v21 = vld [vmem:[%s1921_s21 + $0x448] ss:$16 sps:$4 sm:$0xff]  }
  0x5d   : > { %1184 = vmatpush1.bf16.msra.mxu0 %v1746_v22  ;;  %v1839_v22 = vld [vmem:[%s1921_s21 + $0x32c] ss:$16 sps:$4 sm:$0xff]  }
  0x5e   : > { %1219 = vmatpush1.bf16.msra.mxu1 %v1749_v23  ;;  %1255 = vmatprep.subr.bf16.mxu0 %v1758_v0  ;;  %v1842_v23 = vld [vmem:[%s1921_s21 + $0x42c] ss:$16 sps:$4 sm:$0xff]   ;;  %v1840_v0 = vld [vmem:[%s1921_s21 + $0x428] ss:$16 sps:$4 sm:$0xff]  }
  0x5f   : > { %1220 = vmatprep.subr.bf16.mxu1 %v1755_v24  ;;  %v1837_v24 = vld [vmem:[%s1921_s21 + $0x328] ss:$16 sps:$4 sm:$0xff]  }
  0x60   : > { %1610 = vmatmul.mubr.msk.bf16.vlgmr.msra.gmra.mxu0 %vm1079_vm0, %v2022_v25 }
  0x61   : > { %1256 = vmatpush1.bf16.msra.mxu0 %v1756_v27  ;;  %1287 = vmatprep.mubr.bf16.mxu0 %v1913_v2  ;;  %v1774_v2 = vld [vmem:[%s1921_s21 + $0x288] ss:$16 sps:$4 sm:$0xff]  }
  0x62   : > { %1221 = vmatpush1.bf16.msra.mxu1 %v1753_v26  ;;  %1257 = vmatprep.subr.bf16.mxu0 %v1764_v29  ;;  %v1848_v26 = vld [vmem:[%s1921_s21 + $0x40c] ss:$16 sps:$4 sm:$0xff]   ;;  %v1843_v27 = vld [vmem:[%s1921_s21 + $0x308] ss:$16 sps:$4 sm:$0xff]  }
  0x63   : > { %1222 = vmatprep.subr.bf16.mxu1 %v1761_v28  ;;  %v1846_v28 = vld [vmem:[%s1921_s21 + $0x408] ss:$16 sps:$4 sm:$0xff]  }
  0x65   : > { %1258 = vmatpush1.bf16.msra.mxu0 %v1762_v31 }
  0x66   : > { %1223 = vmatpush1.bf16.msra.mxu1 %v1759_v30  ;;  %1259 = vmatprep.subr.bf16.mxu0 %v1770_v33 }
  0x67   : > { %1224 = vmatprep.subr.bf16.mxu1 %v1767_v32 }
  0x69   : > { %1260 = vmatpush1.bf16.msra.mxu0 %v1768_v35 }
  0x6a   : > { %1225 = vmatpush1.bf16.msra.mxu1 %v1765_v34  ;;  %1261 = vmatprep.subr.bf16.mxu0 %v1776_v37 }
  0x6b   : > { %1226 = vmatprep.subr.bf16.mxu1 %v1773_v36 }
  0x6d   : > { %1262 = vmatpush1.bf16.msra.mxu0 %v1774_v2 }
  0x6e   : > { %1227 = vmatpush1.bf16.msra.mxu1 %v1771_v39  ;;  %1263 = vmatprep.subr.bf16.mxu0 %v1782_v41 }
  0x6f   : > { %1228 = vmatprep.subr.bf16.mxu1 %v1779_v40 }
  0x71   : > { %1264 = vmatpush1.bf16.msra.mxu0 %v1780_v44 }
  0x72   : > { %1229 = vmatpush2.bf16.msra.mxu1 %v1777_v43  ;;  %1265 = vmatprep.subr.bf16.mxu0 %v1788_v46 }
  0x73   : > { %1230 = vmatprep.subr.bf16.mxu1 %v1785_v45 }
  0x75   : > { %1266 = vmatpush1.bf16.msra.mxu0 %v1786_v48 }
  0x76   : > { %1231 = vmatpush2.bf16.msra.mxu1 %v1783_v47  ;;  %1267 = vmatprep.subr.bf16.mxu0 %v1794_v50 }
  0x77   : > { %1232 = vmatprep.subr.bf16.mxu1 %v1791_v49 }
  0x79   : > { %1268 = vmatpush1.bf16.msra.mxu0 %v1792_v52 }
  0x7a   : > { %1233 = vmatpush2.bf16.msra.mxu1 %v1789_v51  ;;  %1269 = vmatprep.subr.bf16.mxu0 %v1800_v54 }
  0x7b   : > { %1234 = vmatprep.subr.bf16.mxu1 %v1797_v53 }
  0x7d   : > { %1270 = vmatpush1.bf16.msra.mxu0 %v1798_v56 }
  0x7e   : > { %1235 = vmatpush2.bf16.msra.mxu1 %v1795_v55  ;;  %1271 = vmatprep.subr.bf16.mxu0 %v1806_v58 }
  0x7f   : > { %1236 = vmatprep.subr.bf16.mxu1 %v1803_v57 }
  0x81   : > { %1272 = vmatpush2.bf16.msra.mxu0 %v1804_v60 }
  0x82   : > { %1237 = vmatpush2.bf16.msra.mxu1 %v1801_v59  ;;  %1273 = vmatprep.subr.bf16.mxu0 %v1812_v62 }
  0x83   : > { %1238 = vmatprep.subr.bf16.mxu1 %v1809_v61 }
  0x85   : > { %1274 = vmatpush2.bf16.msra.mxu0 %v1810_v3 }
  0x86   : > { %1239 = vmatpush2.bf16.msra.mxu1 %v1807_v63  ;;  %1275 = vmatprep.subr.bf16.mxu0 %v1818_v5 }
  0x87   : > { %1240 = vmatprep.subr.bf16.mxu1 %v1815_v4 }
  0x89   : > { %1276 = vmatpush2.bf16.msra.mxu0 %v1816_v7 }
  0x8a   : > { %1241 = vmatpush2.bf16.msra.mxu1 %v1813_v6  ;;  %1277 = vmatprep.subr.bf16.mxu0 %v1824_v11 }
  0x8b   : > { %1242 = vmatprep.subr.bf16.mxu1 %v1821_v10 }
  0x8d   : > { %1278 = vmatpush2.bf16.msra.mxu0 %v1822_v13 }
  0x8e   : > { %1243 = vmatpush2.bf16.msra.mxu1 %v1819_v12  ;;  %1279 = vmatprep.subr.bf16.mxu0 %v1827_v14 }
  0x8f   : > { %1306 = vmatprep.subr.bf16.mxu1 %v1830_v15 }
  0x91   : > { %1245 = vmatmul.mubr.bf16.vlgmr.msra.gmra.mxu1 %v1992_v8  ;;  %1280 = vmatpush2.bf16.msra.mxu0 %v1825_v16  ;;  %v1845_v8 = vld [vmem:[%s1921_s21 + $0x30c] ss:$16 sps:$4 sm:$0xff]  }
  0x92   : > { %1307 = vmatpush1.bf16.msra.mxu1 %v1828_v17  ;;  %1281 = vmatprep.subr.bf16.mxu0 %v1833_v18 }
  0x93   : > { %1308 = vmatprep.subr.bf16.mxu1 %v1836_v19  ;;  %1330 = vmatprep.mubr.bf16.mxu1 %v1873_v1 }
  0x95   : > { %1282 = vmatpush2.bf16.msra.mxu0 %v1831_v20 }
  0x96   : > { %1309 = vmatpush1.bf16.msra.mxu1 %v1834_v21  ;;  %1283 = vmatprep.subr.bf16.mxu0 %v1839_v22 }
  0x97   : > { %1310 = vmatprep.subr.bf16.mxu1 %v1842_v23 }
  0x99   : > { %1284 = vmatpush2.bf16.msra.mxu0 %v1837_v24 }
  0x9a   : > { %1311 = vmatpush1.bf16.msra.mxu1 %v1840_v0  ;;  %1285 = vmatprep.subr.bf16.mxu0 %v1845_v8 }
  0x9b   : > { %1312 = vmatprep.subr.bf16.mxu1 %v1848_v26 }
  0x9d   : > { %1286 = vmatpush2.bf16.msra.mxu0 %v1843_v27 }
  0x9e   : > { %1313 = vmatpush1.bf16.msra.mxu1 %v1846_v28 }
  0xa0   : > { %1288 = vmatmul.mubr.bf16.vlgmr.msra.gmra.mxu0 %v1997_v9 }
  0xa1   : > { %1611 = vmatmul.mubr.msk.bf16.vlgmr.msra.gmra.mxu1 %vm1079_vm0, %v2022_v25 }
  0xb0   : > { %v2100_v29 = vpop.permute.xlu0 %326 }
  0xb4   : > { %v2103_v35 = vpop.permute.xlu0 %331 }
 0x110   : > { %v1117_v1 = vpop.f32.mrf.mxu0 }
 0x111   : > { %v1160_v31 = vpop.f32.mrf.mxu1  ;;  %v1118_v33 = vadd.f32 %v1117_v1, %v2100_v29 }
 0x112   : > { %v1119_v30 = vpop.f32.mrf.mxu0 }
 0x113   : > { %v1162_v34 = vpop.f32.mrf.mxu1  ;;  %v1120_v36 = vadd.f32 %v1119_v30, %v2100_v29  ;;  %v1161_v38 = vadd.f32 %v1160_v31, %v1118_v33 }
 0x114   : > { %v1121_v32 = vpop.f32.mrf.mxu0 }
 0x115   : > { %v1122_v9 = vadd.f32 %v1121_v32, %v2103_v35  ;;  %v1164_v39 = vpop.f32.mrf.mxu1  ;;  %v1163_v25 = vadd.f32 %v1162_v34, %v1120_v36 }
 0x116   : > { %v1123_v37 = vpop.f32.mrf.mxu0 }
 0x117   : > { %v1124_v40 = vadd.f32 %v1123_v37, %v2103_v35  ;;  %v1165_v43 = vadd.f32 %v1164_v39, %v1122_v9  ;;  %v1166_v46 = vpop.f32.mrf.mxu1 }
 0x119   : > { %v1167_v48 = vadd.f32 %v1166_v46, %v1124_v40 }
 0x120   : > { %v1203_v2 = vpop.f32.mrf.mxu0 }
 0x121   : > { %v1204_v41 = vadd.f32 %v1203_v2, %v1161_v38 }
 0x122   : > { %v1205_v42 = vpop.f32.mrf.mxu0 }
 0x123   : > { %v1349_v44 = vmul.f32 0.70710677, %v1204_v41  ;;  %v1206_v45 = vadd.f32 %v1205_v42, %v1163_v25  ;;  %v1341_v56 = vmul.f32 0.5, %v1204_v41 }
 0x124   : > { %v1207_v47 = vpop.f32.mrf.mxu0 }
 0x125   : > { %1849 = verf.f32 %v1349_v44  ;;  %v1350_v49 = vmul.f32 0.70710677, %v1206_v45  ;;  %v1208_v50 = vadd.f32 %v1207_v47, %v1165_v43  ;;  %v1342_v60 = vmul.f32 0.5, %v1206_v45 }
 0x126   : > { %v1209_v51 = vpop.f32.mrf.mxu0 }
 0x127   : > { %1851 = verf.f32 %v1350_v49  ;;  %v1353_v52 = vmul.f32 0.70710677, %v1208_v50  ;;  %v1210_v53 = vadd.f32 %v1209_v51, %v1167_v48  ;;  %v1345_v4 = vmul.f32 0.5, %v1208_v50 }
 0x129   : > { %1853 = verf.f32 %v1353_v52  ;;  %v1354_v54 = vmul.f32 0.70710677, %v1210_v53  ;;  %v1346_v11 = vmul.f32 0.5, %v1210_v53 }
 0x12b   : > { %1855 = verf.f32 %v1354_v54 }
 0x132   : > { %v1850_v55 = vpop.eup %1849 }
 0x133   : > { %v1365_v57 = vadd.f32 1.0, %v1850_v55 }
 0x134   : > { %v1852_v58 = vpop.eup %1851 }
 0x135   : > { %v1373_v59 = vmul.f32 %v1365_v57, %v1341_v56  ;;  %v1366_v61 = vadd.f32 1.0, %v1852_v58 }
 0x136   : > { %v1854_v62 = vpop.eup %1853 }
 0x137   : > { %v1381_v63 = vmul.f32 1.7015043, %v1373_v59  ;;  %v1374_v3 = vmul.f32 %v1366_v61, %v1342_v60  ;;  %v1369_v5 = vadd.f32 1.0, %v1854_v62 }
 0x138   : > { %v1856_v6 = vpop.eup %1855 }
 0x139   : > { %1389 = vst [vmem:[%s2112_s8] sm:$0xff] %v1381_v63  ;;  %v1382_v7 = vmul.f32 1.7015043, %v1374_v3  ;;  %v1377_v10 = vmul.f32 %v1369_v5, %v1345_v4  ;;  %v1370_v12 = vadd.f32 1.0, %v1856_v6 }
 0x13b   : > { %1390 = vst [vmem:[%s2112_s8 + $0x8] sm:$0xff] %v1382_v7  ;;  %v1385_v13 = vmul.f32 1.7015043, %v1377_v10  ;;  %v1378_v14 = vmul.f32 %v1370_v12, %v1346_v11 }
 0x13d   : > { %1394 = vst [vmem:[%s2112_s8 + $0x20] sm:$0xff] %v1385_v13  ;;  %v1386_v15 = vmul.f32 1.7015043, %v1378_v14 }
 0x13f   : > { %1395 = vst [vmem:[%s2112_s8 + $0x28] sm:$0xff] %v1386_v15 }
 0x151   : > { %v1246_v16 = vpop.f32.mrf.mxu1 }
 0x152   : > { %v1247_v20 = vadd.f32 %v1246_v16, %v2100_v29 }
 0x153   : > { %v1248_v17 = vpop.f32.mrf.mxu1 }
 0x154   : > { %v1249_v23 = vadd.f32 %v1248_v17, %v2100_v29 }
 0x155   : > { %v1250_v18 = vpop.f32.mrf.mxu1 }
 0x156   : > { %v1251_v26 = vadd.f32 %v1250_v18, %v2103_v35 }
 0x157   : > { %v1252_v19 = vpop.f32.mrf.mxu1 }
 0x158   : > { %v1253_v34 = vadd.f32 %v1252_v19, %v2103_v35 }
 0x160   : > { %v1289_v21 = vpop.f32.mrf.mxu0 }
 0x161   : > { %v1332_v22 = vpop.f32.mrf.mxu1  ;;  %v1290_v24 = vadd.f32 %v1289_v21, %v1247_v20 }
 0x162   : > { %v1291_v0 = vpop.f32.mrf.mxu0 }
 0x163   : > { %v1334_v8 = vpop.f32.mrf.mxu1  ;;  %v1333_v27 = vadd.f32 %v1332_v22, %v1290_v24  ;;  %v1292_v28 = vadd.f32 %v1291_v0, %v1249_v23 }
 0x164   : > { %v1293_v1 = vpop.f32.mrf.mxu0 }
 0x165   : > { %v1351_v30 = vmul.f32 0.70710677, %v1333_v27  ;;  %v1335_v31 = vadd.f32 %v1334_v8, %v1292_v28  ;;  %v1294_v32 = vadd.f32 %v1293_v1, %v1251_v26  ;;  %v1336_v33 = vpop.f32.mrf.mxu1  ;;  %v1343_v41 = vmul.f32 0.5, %v1333_v27 }
 0x166   : > { %v1295_v36 = vpop.f32.mrf.mxu0 }
 0x167   : > { %1857 = verf.f32 %v1351_v30  ;;  %v1352_v37 = vmul.f32 0.70710677, %v1335_v31  ;;  %v1337_v38 = vadd.f32 %v1336_v33, %v1294_v32  ;;  %v1296_v9 = vadd.f32 %v1295_v36, %v1253_v34  ;;  %v1338_v39 = vpop.f32.mrf.mxu1 }
 0x168   : > { %v1344_v35 = vmul.f32 0.5, %v1335_v31 }
 0x169   : > { %1859 = verf.f32 %v1352_v37  ;;  %v1355_v29 = vmul.f32 0.70710677, %v1337_v38  ;;  %v1339_v2 = vadd.f32 %v1338_v39, %v1296_v9  ;;  %v1347_v49 = vmul.f32 0.5, %v1337_v38 }
 0x16b   : > { %1861 = verf.f32 %v1355_v29  ;;  %v1356_v25 = vmul.f32 0.70710677, %v1339_v2  ;;  %v1348_v54 = vmul.f32 0.5, %v1339_v2 }
 0x16d   : > { %1863 = verf.f32 %v1356_v25 }
 0x174   : > { %v1858_v40 = vpop.eup %1857 }
 0x175   : > { %v1367_v42 = vadd.f32 1.0, %v1858_v40 }
 0x176   : > { %v1860_v43 = vpop.eup %1859 }
 0x177   : > { %v1375_v44 = vmul.f32 %v1367_v42, %v1343_v41  ;;  %v1368_v45 = vadd.f32 1.0, %v1860_v43 }
 0x178   : > { %v1862_v46 = vpop.eup %1861 }
 0x179   : > { %v1383_v47 = vmul.f32 1.7015043, %v1375_v44  ;;  %v1376_v48 = vmul.f32 %v1368_v45, %v1344_v35  ;;  %v1371_v50 = vadd.f32 1.0, %v1862_v46 }
 0x17a   : > { %v1864_v51 = vpop.eup %1863 }
 0x17b   : > { %1391 = vst [vmem:[%s2112_s8 + $0x10] sm:$0xff] %v1383_v47  ;;  %v1384_v52 = vmul.f32 1.7015043, %v1376_v48  ;;  %v1379_v53 = vmul.f32 %v1371_v50, %v1347_v49  ;;  %v1372_v55 = vadd.f32 1.0, %v1864_v51 }
 0x17d   : > { %1393 = vst.msk [vmem:[%s2112_s8 + $0x18] sm:$0xff] %vm1392_vm1, %v1384_v52  ;;  %v1387_v56 = vmul.f32 1.7015043, %v1379_v53  ;;  %v1380_v57 = vmul.f32 %v1372_v55, %v1348_v54 }
 0x17f   : > { %1396 = vst [vmem:[%s2112_s8 + $0x30] sm:$0xff] %v1387_v56  ;;  %v1388_v58 = vmul.f32 1.7015043, %v1380_v57 }
 0x181   : > { %1397 = vst.msk [vmem:[%s2112_s8 + $0x38] sm:$0xff] %vm1392_vm1, %v1388_v58 }
 0x182 PF: > { %s13_s12 = sadd.s32 1, %s1871_s12  }
 0x183   : > { %p10_p4 = scmp.ge.s32.totalorder %s13_s12, 4  }
 0x185   :  { %12 = sbr.rel (!%p10_p4) target bundleno = 1 (0x1), region = 62 }

// kernel: aot_block_nf_forward.3
= control target key start
LH: loop header
LB: loop body
LE: loop exit
PB: predicated region body
PF: predicated region fallthrough
CT: control target
= control target key end

     0   :  { %s1557_s24 = smov 0   ;;  %s1746_s0 = inlined_call_operand.vmem [shape: bf16[2,144,400], index: 0, kind: input, shape index: {}]   ;;  %s1747_s1 = inlined_call_operand.vmem [shape: bf16[2,144,400], index: 1, kind: input, shape index: {}]   ;;  %s1748_s2 = inlined_call_operand.vmem [shape: f32[2,16,400], index: 2, kind: input, shape index: {}]   ;;  %s1749_s3 = inlined_call_operand.vmem [shape: bf16[16,144], index: 3, kind: input, shape index: {}]   ;;  %s1750_s4 = inlined_call_operand.vmem [shape: bf16[16,144], index: 4, kind: input, shape index: {}]   ;;  %s1751_s5 = inlined_call_operand.vmem [shape: f32[16,1], index: 5, kind: input, shape index: {}]   ;;  %s1752_s6 = inlined_call_operand.vmem [shape: f32[16,1], index: 6, kind: input, shape index: {}]   ;;  %s1753_s7 = inlined_call_operand.vmem [shape: f32[2,16,400], index: 7, kind: output, shape index: {}]  }
   0x1 LB: > { %s1239_s25 = sadd.s32 4294967295, %s1514_s24   ;;  %p1243_p0 = scmp.ge.s32.totalorder %s1514_s24, 1  ;;  %s1514_s24 = sphi %s1557_s24, %s17_s24  }
   0x2   : > { %p257_p1 = scmp.lt.s32.totalorder %s1514_s24, 3 }
   0x4   : > { %p258_p2 = pnand %p1243_p0, %p257_p1 }
   0x5   : > { %p299_p3 = scmp.lt.s32.totalorder (!%p258_p2), %s1239_s25, 1 }
   0x6   : > { %261 = sbr.rel (%p258_p2) target bundleno = 665 (0x299), region = 48 }
   0xb   : > { %vm559_vm0 = vcmask 130048   ;;  %v1410_v0 = vld [vmem:[%s1749_s3 + $0x4] ss:$8 sps:$4 sm:$0xff]   ;;  %s1755_s25 = smov (!%p299_p3, %s1239_s25), 1  ;;  %v1516_v1 = vmov 0  }
   0xc   : > { %1352 = vset.pattern.permute.xlu0 %v1516_v1  ;;  %v687_v2 = vld [vmem:[%s1752_s6] sm:$0xff]  ;;  %1353 = vset.pattern.permute.xlu1 %v1516_v1  ;;  %s1342_s30 = smul.u32 288, %s1755_s25  ;;  %v688_v3 = vld [vmem:[%s1752_s6 + $0x8] sm:$0xff]  ;;  %s1340_s28 = sshll.u32 %s1755_s25, 6 }
   0xd   : > { %1288 = vmatprep.mubr.msk.bf16.mxu0 %vm559_vm0, %v1410_v0  ;;  %1289 = vmatprep.mubr.msk.bf16.mxu1 %vm559_vm0, %v1410_v0  ;;  %v1408_v42 = vld [vmem:[%s1749_s3] ss:$8 sps:$4 sm:$0xff]   ;;  %v1465_v47 = vld [vmem:[%s1750_s4 + $0x4] ss:$8 sps:$4 sm:$0xff]   ;;  %s1708_s8 = scalar_lea.vmem %s1748_s2, %s1340_s28  ;;  %s1729_s11 = scalar_lea.vmem %s1753_s7, %s1340_s28 }
   0xe   : > { %691 = vperm.xlu0 %1352, %v687_v2   ;;  %s1584_s12 = scalar_lea.vmem %s1746_s0, %s1342_s30  ;;  %s1619_s15 = scalar_lea.vmem %s1747_s1, %s1342_s30 }
   0xf   : > { %v1354_v4 = vld [vmem:[%s1584_s12 + $0xe4] ss:$16 sps:$4 sm:$0xff]   ;;  %v1356_v5 = vld [vmem:[%s1584_s12 + $0xec] ss:$16 sps:$4 sm:$0xff]   ;;  %v1358_v6 = vld [vmem:[%s1584_s12 + $0xe0] ss:$16 sps:$4 sm:$0xff]  }
  0x10   : > { %563 = vmatprep.subr.bf16.mxu0 %v1354_v4  ;;  %v1359_v7 = vld [vmem:[%s1584_s12 + $0xe8] ss:$16 sps:$4 sm:$0xff]   ;;  %606 = vmatprep.subr.bf16.mxu1 %v1356_v5  ;;  %v1360_v8 = vld [vmem:[%s1584_s12 + $0xc4] ss:$16 sps:$4 sm:$0xff]   ;;  %v1362_v9 = vld [vmem:[%s1584_s12 + $0xcc] ss:$16 sps:$4 sm:$0xff]  }
  0x11   : > { %564 = vmatpush1.bf16.msra.mxu0 %v1358_v6  ;;  %607 = vmatpush1.bf16.msra.mxu1 %v1359_v7  ;;  %v1364_v10 = vld [vmem:[%s1584_s12 + $0xc0] ss:$16 sps:$4 sm:$0xff]   ;;  %v1365_v11 = vld [vmem:[%s1584_s12 + $0xc8] ss:$16 sps:$4 sm:$0xff]   ;;  %v1366_v12 = vld [vmem:[%s1584_s12 + $0xa4] ss:$16 sps:$4 sm:$0xff]  }
  0x12   : > { %696 = vperm.xlu0 %1352, %v688_v3   ;;  %565 = vmatprep.subr.bf16.mxu0 %v1360_v8  ;;  %v1368_v13 = vld [vmem:[%s1584_s12 + $0xac] ss:$16 sps:$4 sm:$0xff]   ;;  %v1370_v14 = vld [vmem:[%s1584_s12 + $0xa0] ss:$16 sps:$4 sm:$0xff]   ;;  %v1371_v15 = vld [vmem:[%s1584_s12 + $0xa8] ss:$16 sps:$4 sm:$0xff]  }
  0x13   : > { %608 = vmatprep.subr.bf16.mxu1 %v1362_v9  ;;  %v1372_v16 = vld [vmem:[%s1584_s12 + $0x84] ss:$16 sps:$4 sm:$0xff]   ;;  %v1374_v17 = vld [vmem:[%s1584_s12 + $0x8c] ss:$16 sps:$4 sm:$0xff]   ;;  %v1376_v18 = vld [vmem:[%s1584_s12 + $0x80] ss:$16 sps:$4 sm:$0xff]  }
  0x14   : > { %v1377_v19 = vld [vmem:[%s1584_s12 + $0x88] ss:$16 sps:$4 sm:$0xff]   ;;  %v1378_v20 = vld [vmem:[%s1584_s12 + $0x64] ss:$16 sps:$4 sm:$0xff]   ;;  %v1380_v21 = vld [vmem:[%s1584_s12 + $0x6c] ss:$16 sps:$4 sm:$0xff]  }
  0x15   : > { %566 = vmatpush1.bf16.msra.mxu0 %v1364_v10  ;;  %609 = vmatpush1.bf16.msra.mxu1 %v1365_v11  ;;  %v1382_v22 = vld [vmem:[%s1584_s12 + $0x60] ss:$16 sps:$4 sm:$0xff]   ;;  %v1383_v23 = vld [vmem:[%s1584_s12 + $0x68] ss:$16 sps:$4 sm:$0xff]   ;;  %v1384_v24 = vld [vmem:[%s1584_s12 + $0x44] ss:$16 sps:$4 sm:$0xff]  }
  0x16   : > { %567 = vmatprep.subr.bf16.mxu0 %v1366_v12  ;;  %610 = vmatprep.subr.bf16.mxu1 %v1368_v13  ;;  %v1386_v25 = vld [vmem:[%s1584_s12 + $0x4c] ss:$16 sps:$4 sm:$0xff]   ;;  %v1388_v26 = vld [vmem:[%s1584_s12 + $0x40] ss:$16 sps:$4 sm:$0xff]   ;;  %v1389_v27 = vld [vmem:[%s1584_s12 + $0x48] ss:$16 sps:$4 sm:$0xff]  }
  0x17   : > { %v1390_v28 = vld [vmem:[%s1584_s12 + $0x24] ss:$16 sps:$4 sm:$0xff]   ;;  %v1392_v29 = vld [vmem:[%s1584_s12 + $0x2c] ss:$16 sps:$4 sm:$0xff]   ;;  %v1394_v30 = vld [vmem:[%s1584_s12 + $0x20] ss:$16 sps:$4 sm:$0xff]  }
  0x18   : > { %v1395_v31 = vld [vmem:[%s1584_s12 + $0x28] ss:$16 sps:$4 sm:$0xff]   ;;  %v1396_v32 = vld [vmem:[%s1584_s12 + $0x4] ss:$16 sps:$4 sm:$0xff]   ;;  %v1398_v33 = vld [vmem:[%s1584_s12 + $0xc] ss:$16 sps:$4 sm:$0xff]  }
  0x19   : > { %568 = vmatpush1.bf16.msra.mxu0 %v1370_v14  ;;  %611 = vmatpush1.bf16.msra.mxu1 %v1371_v15  ;;  %v1400_v34 = vld [vmem:[%s1584_s12] ss:$16 sps:$4 sm:$0xff]   ;;  %v1401_v35 = vld [vmem:[%s1584_s12 + $0x8] ss:$16 sps:$4 sm:$0xff]   ;;  %v1402_v36 = vld [vmem:[%s1584_s12 + $0x104] ss:$16 sps:$4 sm:$0xff]  }
  0x1a   : > { %569 = vmatprep.subr.bf16.mxu0 %v1372_v16  ;;  %612 = vmatprep.subr.bf16.mxu1 %v1374_v17  ;;  %v1404_v37 = vld [vmem:[%s1584_s12 + $0x10c] ss:$16 sps:$4 sm:$0xff]   ;;  %v1406_v38 = vld [vmem:[%s1584_s12 + $0x100] ss:$16 sps:$4 sm:$0xff]   ;;  %v1407_v39 = vld [vmem:[%s1584_s12 + $0x108] ss:$16 sps:$4 sm:$0xff]  }
  0x1b   : > { %v1413_v40 = vld [vmem:[%s1619_s15 + $0xe4] ss:$16 sps:$4 sm:$0xff]   ;;  %v1416_v41 = vld [vmem:[%s1619_s15 + $0xec] ss:$16 sps:$4 sm:$0xff]   ;;  %v1411_v43 = vld [vmem:[%s1619_s15 + $0xe0] ss:$16 sps:$4 sm:$0xff]  }
  0x1c   : > { %v1414_v44 = vld [vmem:[%s1619_s15 + $0xe8] ss:$16 sps:$4 sm:$0xff]   ;;  %v1419_v45 = vld [vmem:[%s1619_s15 + $0xc4] ss:$16 sps:$4 sm:$0xff]   ;;  %v1422_v46 = vld [vmem:[%s1619_s15 + $0xcc] ss:$16 sps:$4 sm:$0xff]  }
  0x1d   : > { %570 = vmatpush1.bf16.msra.mxu0 %v1376_v18  ;;  %613 = vmatpush1.bf16.msra.mxu1 %v1377_v19  ;;  %v1417_v48 = vld [vmem:[%s1619_s15 + $0xc0] ss:$16 sps:$4 sm:$0xff]   ;;  %v1420_v49 = vld [vmem:[%s1619_s15 + $0xc8] ss:$16 sps:$4 sm:$0xff]   ;;  %v1425_v50 = vld [vmem:[%s1619_s15 + $0xa4] ss:$16 sps:$4 sm:$0xff]  }
  0x1e   : > { %571 = vmatprep.subr.bf16.mxu0 %v1378_v20  ;;  %614 = vmatprep.subr.bf16.mxu1 %v1380_v21  ;;  %v1428_v51 = vld [vmem:[%s1619_s15 + $0xac] ss:$16 sps:$4 sm:$0xff]   ;;  %v1423_v52 = vld [vmem:[%s1619_s15 + $0xa0] ss:$16 sps:$4 sm:$0xff]   ;;  %v1426_v53 = vld [vmem:[%s1619_s15 + $0xa8] ss:$16 sps:$4 sm:$0xff]  }
  0x1f   : > { %v1431_v54 = vld [vmem:[%s1619_s15 + $0x84] ss:$16 sps:$4 sm:$0xff]   ;;  %v1434_v55 = vld [vmem:[%s1619_s15 + $0x8c] ss:$16 sps:$4 sm:$0xff]   ;;  %v1429_v56 = vld [vmem:[%s1619_s15 + $0x80] ss:$16 sps:$4 sm:$0xff]  }
  0x20   : > { %v1432_v57 = vld [vmem:[%s1619_s15 + $0x88] ss:$16 sps:$4 sm:$0xff]   ;;  %v1437_v58 = vld [vmem:[%s1619_s15 + $0x64] ss:$16 sps:$4 sm:$0xff]   ;;  %v1440_v59 = vld [vmem:[%s1619_s15 + $0x6c] ss:$16 sps:$4 sm:$0xff]  }
  0x21   : > { %572 = vmatpush1.bf16.msra.mxu0 %v1382_v22  ;;  %615 = vmatpush1.bf16.msra.mxu1 %v1383_v23  ;;  %v1435_v60 = vld [vmem:[%s1619_s15 + $0x60] ss:$16 sps:$4 sm:$0xff]   ;;  %v1438_v61 = vld [vmem:[%s1619_s15 + $0x68] ss:$16 sps:$4 sm:$0xff]   ;;  %v1443_v62 = vld [vmem:[%s1619_s15 + $0x44] ss:$16 sps:$4 sm:$0xff]  }
  0x22   : > { %573 = vmatprep.subr.bf16.mxu0 %v1384_v24  ;;  %616 = vmatprep.subr.bf16.mxu1 %v1386_v25  ;;  %v1446_v63 = vld [vmem:[%s1619_s15 + $0x4c] ss:$16 sps:$4 sm:$0xff]   ;;  %v1441_v0 = vld [vmem:[%s1619_s15 + $0x40] ss:$16 sps:$4 sm:$0xff]   ;;  %v1444_v1 = vld [vmem:[%s1619_s15 + $0x48] ss:$16 sps:$4 sm:$0xff]  }
  0x23   : > { %v1449_v2 = vld [vmem:[%s1619_s15 + $0x24] ss:$16 sps:$4 sm:$0xff]   ;;  %v1452_v3 = vld [vmem:[%s1619_s15 + $0x2c] ss:$16 sps:$4 sm:$0xff]   ;;  %v1447_v4 = vld [vmem:[%s1619_s15 + $0x20] ss:$16 sps:$4 sm:$0xff]  }
  0x24   : > { %v1450_v5 = vld [vmem:[%s1619_s15 + $0x28] ss:$16 sps:$4 sm:$0xff]   ;;  %v1455_v6 = vld [vmem:[%s1619_s15 + $0x4] ss:$16 sps:$4 sm:$0xff]   ;;  %v1458_v7 = vld [vmem:[%s1619_s15 + $0xc] ss:$16 sps:$4 sm:$0xff]  }
  0x25   : > { %574 = vmatpush1.bf16.msra.mxu0 %v1388_v26  ;;  %617 = vmatpush1.bf16.msra.mxu1 %v1389_v27  ;;  %v1453_v8 = vld [vmem:[%s1619_s15] ss:$16 sps:$4 sm:$0xff]   ;;  %v1456_v9 = vld [vmem:[%s1619_s15 + $0x8] ss:$16 sps:$4 sm:$0xff]   ;;  %v1461_v10 = vld [vmem:[%s1619_s15 + $0x104] ss:$16 sps:$4 sm:$0xff]  }
  0x26   : > { %575 = vmatprep.subr.bf16.mxu0 %v1390_v28  ;;  %618 = vmatprep.subr.bf16.mxu1 %v1392_v29  ;;  %v1464_v11 = vld [vmem:[%s1619_s15 + $0x10c] ss:$16 sps:$4 sm:$0xff]   ;;  %v1459_v12 = vld [vmem:[%s1619_s15 + $0x100] ss:$16 sps:$4 sm:$0xff]   ;;  %v1462_v13 = vld [vmem:[%s1619_s15 + $0x108] ss:$16 sps:$4 sm:$0xff]  }
  0x27   : > { %v1467_v14 = vld [vmem:[%s1750_s4] ss:$8 sps:$4 sm:$0xff]  }
  0x29   : > { %576 = vmatpush1.bf16.msra.mxu0 %v1394_v30  ;;  %619 = vmatpush1.bf16.msra.mxu1 %v1395_v31 }
  0x2a   : > { %577 = vmatprep.subr.bf16.mxu0 %v1396_v32  ;;  %620 = vmatprep.subr.bf16.mxu1 %v1398_v33 }
  0x2d   : > { %578 = vmatpush1.bf16.msra.mxu0 %v1400_v34  ;;  %621 = vmatpush1.bf16.msra.mxu1 %v1401_v35 }
  0x2e   : > { %593 = vmatprep.subr.bf16.mxu0 %v1402_v36  ;;  %636 = vmatprep.subr.bf16.mxu1 %v1404_v37 }
  0x31   : > { %594 = vmatpush2.bf16.msra.mxu0 %v1406_v38  ;;  %637 = vmatpush2.bf16.msra.mxu1 %v1407_v39 }
  0x32   : > { %891 = vmatprep.subr.bf16.mxu0 %v1413_v40  ;;  %934 = vmatprep.subr.bf16.mxu1 %v1416_v41 }
  0x34   : > { %596 = vmatmul.mubr.bf16.vlgmr.msra.gmra.mxu0 %v1408_v42  ;;  %639 = vmatmul.mubr.bf16.vlgmr.msra.gmra.mxu1 %v1408_v42 }
  0x35   : > { %892 = vmatpush1.bf16.msra.mxu0 %v1411_v43  ;;  %935 = vmatpush1.bf16.msra.mxu1 %v1414_v44 }
  0x36   : > { %893 = vmatprep.subr.bf16.mxu0 %v1419_v45  ;;  %936 = vmatprep.subr.bf16.mxu1 %v1422_v46 }
  0x37   : > { %1328 = vmatprep.mubr.msk.bf16.mxu0 %vm559_vm0, %v1465_v47  ;;  %1329 = vmatprep.mubr.msk.bf16.mxu1 %vm559_vm0, %v1465_v47 }
  0x39   : > { %894 = vmatpush1.bf16.msra.mxu0 %v1417_v48  ;;  %937 = vmatpush1.bf16.msra.mxu1 %v1420_v49 }
  0x3a   : > { %895 = vmatprep.subr.bf16.mxu0 %v1425_v50  ;;  %938 = vmatprep.subr.bf16.mxu1 %v1428_v51 }
  0x3d   : > { %896 = vmatpush1.bf16.msra.mxu0 %v1423_v52  ;;  %939 = vmatpush1.bf16.msra.mxu1 %v1426_v53 }
  0x3e   : > { %897 = vmatprep.subr.bf16.mxu0 %v1431_v54  ;;  %940 = vmatprep.subr.bf16.mxu1 %v1434_v55 }
  0x41   : > { %898 = vmatpush1.bf16.msra.mxu0 %v1429_v56  ;;  %941 = vmatpush1.bf16.msra.mxu1 %v1432_v57 }
  0x42   : > { %899 = vmatprep.subr.bf16.mxu0 %v1437_v58  ;;  %942 = vmatprep.subr.bf16.mxu1 %v1440_v59 }
  0x45   : > { %900 = vmatpush1.bf16.msra.mxu0 %v1435_v60  ;;  %943 = vmatpush1.bf16.msra.mxu1 %v1438_v61 }
  0x46   : > { %901 = vmatprep.subr.bf16.mxu0 %v1443_v62  ;;  %944 = vmatprep.subr.bf16.mxu1 %v1446_v63 }
  0x49   : > { %902 = vmatpush1.bf16.msra.mxu0 %v1441_v0  ;;  %945 = vmatpush1.bf16.msra.mxu1 %v1444_v1 }
  0x4a   : > { %903 = vmatprep.subr.bf16.mxu0 %v1449_v2  ;;  %946 = vmatprep.subr.bf16.mxu1 %v1452_v3 }
  0x4d   : > { %904 = vmatpush1.bf16.msra.mxu0 %v1447_v4  ;;  %947 = vmatpush1.bf16.msra.mxu1 %v1450_v5 }
  0x4e   : > { %905 = vmatprep.subr.bf16.mxu0 %v1455_v6  ;;  %948 = vmatprep.subr.bf16.mxu1 %v1458_v7 }
  0x51   : > { %906 = vmatpush1.bf16.msra.mxu0 %v1453_v8  ;;  %949 = vmatpush1.bf16.msra.mxu1 %v1456_v9 }
  0x52   : > { %921 = vmatprep.subr.bf16.mxu0 %v1461_v10  ;;  %964 = vmatprep.subr.bf16.mxu1 %v1464_v11 }
  0x55   : > { %922 = vmatpush2.bf16.msra.mxu0 %v1459_v12  ;;  %965 = vmatpush2.bf16.msra.mxu1 %v1462_v13  ;;  %v358_v13 = vld [vmem:[%s1751_s5] sm:$0xff] }
  0x58   : > { %924 = vmatmul.mubr.bf16.vlgmr.msra.gmra.mxu0 %v1467_v14  ;;  %967 = vmatmul.mubr.bf16.vlgmr.msra.gmra.mxu1 %v1467_v14  ;;  %v359_v14 = vld [vmem:[%s1751_s5 + $0x8] sm:$0xff] }
  0x89   : > { %v692_v23 = vpop.permute.xlu0 %691 }
  0x8d   : > { %v697_v34 = vpop.permute.xlu0 %696 }
  0xf4   : > { %v1676_v15 = vpop.f32.mrf.mxu0  ;;  %v1678_v16 = vpop.f32.mrf.mxu1 }
  0xf6   : > { %v1680_v17 = vpop.f32.mrf.mxu0  ;;  %v1682_v18 = vpop.f32.mrf.mxu1 }
  0xf8   : > { %v1684_v19 = vpop.f32.mrf.mxu0  ;;  %v1686_v20 = vpop.f32.mrf.mxu1 }
  0xfa   : > { %v1688_v21 = vpop.f32.mrf.mxu0  ;;  %v1690_v22 = vpop.f32.mrf.mxu1 }
 0x118   : > { %v925_v24 = vpop.f32.mrf.mxu0  ;;  %v968_v25 = vpop.f32.mrf.mxu1 }
 0x119   : > { %v926_v28 = vadd.f32 %v925_v24, %v692_v23  ;;  %v969_v33 = vadd.f32 %v968_v25, %v692_v23 }
 0x11a   : > { %v927_v26 = vpop.f32.mrf.mxu0  ;;  %v970_v27 = vpop.f32.mrf.mxu1 }
 0x11b   : > { %v928_v29 = vadd.f32 %v927_v26, %v692_v23  ;;  %v971_v30 = vadd.f32 %v970_v27, %v692_v23 }
 0x11c   : > { %v929_v31 = vpop.f32.mrf.mxu0  ;;  %v972_v32 = vpop.f32.mrf.mxu1 }
 0x11d   : > { %v977_v35 = vadd.f32 %v928_v29, %v926_v28  ;;  %v930_v38 = vadd.f32 %v929_v31, %v697_v34  ;;  %v979_v42 = vsel %vm559_vm0, %v971_v30, 0.0  ;;  %v973_v43 = vadd.f32 %v972_v32, %v697_v34 }
 0x11e   : > { %v931_v36 = vpop.f32.mrf.mxu0  ;;  %v974_v37 = vpop.f32.mrf.mxu1 }
 0x11f   : > { %v932_v39 = vadd.f32 %v931_v36, %v697_v34  ;;  %v978_v40 = vadd.f32 %v977_v35, %v969_v33  ;;  %v975_v41 = vadd.f32 %v974_v37, %v697_v34 }
 0x121   : > { %v983_v44 = vadd.f32 %v932_v39, %v930_v38  ;;  %v980_v45 = vadd.f32 %v979_v42, %v978_v40  ;;  %v985_v47 = vsel %vm559_vm0, %v975_v41, 0.0 }
 0x123   : > { %981 = vadd.xlane.f32.xlu1 %v980_v45  ;;  %v984_v46 = vadd.f32 %v983_v44, %v973_v43 }
 0x125   : > { %v986_v48 = vadd.f32 %v985_v47, %v984_v46 }
 0x127   : > { %987 = vadd.xlane.f32.xlu1 %v986_v48 }
 0x1ac   : > { %v982_v49 = vpop.xlane.xlu1 %981 }
 0x1ad   : > { %v990_v50 = vmul.f32 0.0025, %v982_v49 }
 0x1af   : > { %v992_v51 = vsub.f32 %v926_v28, %v990_v50  ;;  %v993_v52 = vsub.f32 %v928_v29, %v990_v50  ;;  %v995_v53 = vsub.f32 %v971_v30, %v990_v50  ;;  %v994_v55 = vsub.f32 %v969_v33, %v990_v50 }
 0x1b0   : > { %v988_v54 = vpop.xlane.xlu1 %987 }
 0x1b1   : > { %v991_v56 = vmul.f32 0.0025, %v988_v54  ;;  %v1000_v57 = vmul.f32 %v992_v51, %v992_v51  ;;  %v1001_v58 = vmul.f32 %v993_v52, %v993_v52  ;;  %v1003_v61 = vmul.f32 %v995_v53, %v995_v53 }
 0x1b2   : > { %v1002_v63 = vmul.f32 %v994_v55, %v994_v55  ;;  %v1039_v40 = vmul.f32 10.0, %v993_v52  ;;  %v1041_v42 = vmul.f32 10.0, %v995_v53 }
 0x1b3   : > { %v996_v59 = vsub.f32 %v930_v38, %v991_v56  ;;  %v997_v60 = vsub.f32 %v932_v39, %v991_v56  ;;  %v998_v62 = vsub.f32 %v973_v43, %v991_v56  ;;  %v1008_v0 = vadd.f32 %v1001_v58, %v1000_v57 }
 0x1b4   : > { %v999_v1 = vsub.f32 %v975_v41, %v991_v56  ;;  %v1010_v6 = vsel %vm559_vm0, %v1003_v61, 0.0  ;;  %v1038_v39 = vmul.f32 10.0, %v992_v51  ;;  %v1040_v41 = vmul.f32 10.0, %v994_v55 }
 0x1b5   : > { %v1004_v2 = vmul.f32 %v996_v59, %v996_v59  ;;  %v1005_v3 = vmul.f32 %v997_v60, %v997_v60  ;;  %v1009_v4 = vadd.f32 %v1008_v0, %v1002_v63  ;;  %v1006_v7 = vmul.f32 %v998_v62, %v998_v62 }
 0x1b6   : > { %v1007_v5 = vmul.f32 %v999_v1, %v999_v1  ;;  %v1042_v48 = vmul.f32 10.0, %v996_v59  ;;  %v1043_v49 = vmul.f32 10.0, %v997_v60  ;;  %v1044_v50 = vmul.f32 10.0, %v998_v62 }
 0x1b7   : > { %v1014_v8 = vadd.f32 %v1005_v3, %v1004_v2  ;;  %v1011_v9 = vadd.f32 %v1010_v6, %v1009_v4  ;;  %v1045_v54 = vmul.f32 10.0, %v999_v1 }
 0x1b8   : > { %v1016_v11 = vsel %vm559_vm0, %v1007_v5, 0.0 }
 0x1b9   : > { %v1015_v10 = vadd.f32 %v1014_v8, %v1006_v7  ;;  %1012 = vadd.xlane.f32.xlu0 %v1011_v9 }
 0x1bb   : > { %v1017_v12 = vadd.f32 %v1016_v11, %v1015_v10 }
 0x1bd   : > { %1018 = vadd.xlane.f32.xlu1 %v1017_v12 }
 0x1ce   : > { %362 = vperm.xlu1 %1353, %v358_v13  }
 0x1d2   : > { %367 = vperm.xlu1 %1353, %v359_v14  }
 0x242   : > { %v1013_v23 = vpop.xlane.xlu0 %1012 }
 0x243   : > { %v1020_v24 = vmul.f32 0.0025062656, %v1013_v23 }
 0x245   : > { %1468 = vrsqrt.f32 %v1020_v24  ;;  %vm1024_vm1 = vcmp.eq.f32.partialorder %v1020_v24, inf  ;;  %v1027_v29 = vand.u32 2147483648, %v1020_v24  ;;  %vm1026_vm2 = vcmp.eq.f32.partialorder %v1020_v24, 0.0 }
 0x246   : > { %v1019_v25 = vpop.xlane.xlu1 %1018 }
 0x247   : > { %v1021_v26 = vmul.f32 0.0025062656, %v1019_v25 }
 0x249   : > { %1470 = vrsqrt.f32 %v1021_v26  ;;  %vm1031_vm3 = vcmp.eq.f32.partialorder %v1021_v26, inf  ;;  %v1034_v35 = vand.u32 2147483648, %v1021_v26  ;;  %vm1033_vm4 = vcmp.eq.f32.partialorder %v1021_v26, 0.0 }
 0x252   : > { %v1469_v27 = vpop.eup %1468 }
 0x253   : > { %v1023_v28 = vmul.f32 %v1469_v27, %v1020_v24 }
 0x255   : > { %v1025_v31 = vsel %vm1024_vm1, %v1020_v24, %v1023_v28  ;;  %v363_v24 = vpop.permute.xlu1 %362  ;;  %v1104_v28 = vld [vmem:[%s1708_s8] sm:$0xff] }
 0x256   : > { %v1471_v30 = vpop.eup %1470  ;;  %v1028_v32 = vsel %vm1026_vm2, %v1027_v29, %v1025_v31  ;;  %v598_v29 = vadd.f32 %v1676_v15, %v363_v24 }
 0x257   : > { %v1030_v33 = vmul.f32 %v1471_v30, %v1021_v26  ;;  %v1036_v34 = vadd.f32 1e-09, %v1028_v32  ;;  %v600_v30 = vadd.f32 %v1680_v17, %v363_v24  ;;  %v1105_v32 = vld [vmem:[%s1708_s8 + $0x8] sm:$0xff] }
 0x259   : > { %v1032_v36 = vsel %vm1031_vm3, %v1021_v26, %v1030_v33  ;;  %1472 = vrcp.f32 %v1036_v34  ;;  %v368_v26 = vpop.permute.xlu1 %367  ;;  %v641_v34 = vadd.f32 %v1678_v16, %v363_v24 }
 0x25a   : > { %v1035_v37 = vsel %vm1033_vm4, %v1034_v35, %v1032_v36  ;;  %v643_v35 = vadd.f32 %v1682_v18, %v363_v24  ;;  %v602_v36 = vadd.f32 %v1684_v19, %v368_v26  ;;  %v647_v15 = vadd.f32 %v1690_v22, %v368_v26  ;;  %v1109_v22 = vld [vmem:[%s1708_s8 + $0x28] sm:$0xff] }
 0x25b   : > { %v1037_v38 = vadd.f32 1e-09, %v1035_v37 }
 0x25d   : > { %1474 = vrcp.f32 %v1037_v38  ;;  %v1106_v38 = vld [vmem:[%s1708_s8 + $0x10] sm:$0xff] }
 0x266   : > { %v1473_v43 = vpop.eup %1472 }
 0x267   : > { %v1047_v44 = vmul.f32 %v1473_v43, %v1038_v39  ;;  %v1048_v45 = vmul.f32 %v1473_v43, %v1039_v40  ;;  %v1049_v46 = vmul.f32 %v1473_v43, %v1040_v41  ;;  %v1050_v47 = vmul.f32 %v1473_v43, %v1041_v42  ;;  %v1107_v42 = vld [vmem:[%s1708_s8 + $0x18] sm:$0xff] }
 0x268   : > { %v604_v40 = vadd.f32 %v1688_v21, %v368_v26  ;;  %v645_v41 = vadd.f32 %v1686_v20, %v368_v26 }
 0x269   : > { %v1330_v57 = vmul.f32 -1.442695, %v1047_v44  ;;  %v1331_v58 = vmul.f32 -1.442695, %v1048_v45  ;;  %v1332_v61 = vmul.f32 -1.442695, %v1049_v46 }
 0x26a   : > { %v1475_v56 = vpop.eup %1474  ;;  %v1333_v63 = vmul.f32 -1.442695, %v1050_v47 }
 0x26b   : > { %v1052_v0 = vmul.f32 %v1475_v56, %v1042_v48  ;;  %v1053_v2 = vmul.f32 %v1475_v56, %v1043_v49  ;;  %v1054_v51 = vmul.f32 %v1475_v56, %v1044_v50  ;;  %1476 = vpow2.f32 %v1330_v57  ;;  %v1108_v49 = vld [vmem:[%s1708_s8 + $0x20] sm:$0xff] }
 0x26c   : > { %v1055_v52 = vmul.f32 %v1475_v56, %v1045_v54  ;;  %1478 = vpow2.f32 %v1331_v58 }
 0x26d   : > { %v1334_v53 = vmul.f32 -1.442695, %v1052_v0  ;;  %v1335_v55 = vmul.f32 -1.442695, %v1053_v2  ;;  %1480 = vpow2.f32 %v1332_v61  ;;  %v1336_v3 = vmul.f32 -1.442695, %v1054_v51 }
 0x26e   : > { %1482 = vpow2.f32 %v1333_v63  ;;  %v1337_v59 = vmul.f32 -1.442695, %v1055_v52  ;;  %v1110_v63 = vld [vmem:[%s1708_s8 + $0x30] sm:$0xff] }
 0x26f   : > { %1484 = vpow2.f32 %v1334_v53 }
 0x270   : > { %1486 = vpow2.f32 %v1335_v55  ;;  %v1111_v55 = vld [vmem:[%s1708_s8 + $0x38] sm:$0xff] }
 0x271   : > { %1488 = vpow2.f32 %v1336_v3 }
 0x272   : > { %1490 = vpow2.f32 %v1337_v59 }
 0x278   : > { %v1477_v60 = vpop.eup %1476 }
 0x279   : > { %v1479_v62 = vpop.eup %1478  ;;  %v1080_v1 = vadd.f32 1.0, %v1477_v60 }
 0x27a   : > { %v1481_v4 = vpop.eup %1480  ;;  %v1081_v5 = vadd.f32 1.0, %v1479_v62 }
 0x27b   : > { %v1483_v6 = vpop.eup %1482  ;;  %v1082_v7 = vadd.f32 1.0, %v1481_v4  ;;  %1492 = vrcp.f32 %v1080_v1 }
 0x27c   : > { %v1485_v8 = vpop.eup %1484  ;;  %v1083_v9 = vadd.f32 1.0, %v1483_v6  ;;  %1494 = vrcp.f32 %v1081_v5 }
 0x27d   : > { %v1487_v10 = vpop.eup %1486  ;;  %1496 = vrcp.f32 %v1082_v7  ;;  %v1084_v11 = vadd.f32 1.0, %v1485_v8 }
 0x27e   : > { %v1489_v12 = vpop.eup %1488  ;;  %1498 = vrcp.f32 %v1083_v9  ;;  %v1085_v13 = vadd.f32 1.0, %v1487_v10 }
 0x27f   : > { %v1491_v14 = vpop.eup %1490  ;;  %v1086_v23 = vadd.f32 1.0, %v1489_v12  ;;  %1500 = vrcp.f32 %v1084_v11 }
 0x280   : > { %v1087_v25 = vadd.f32 1.0, %v1491_v14  ;;  %1502 = vrcp.f32 %v1085_v13 }
 0x281   : > { %1504 = vrcp.f32 %v1086_v23 }
 0x282   : > { %1506 = vrcp.f32 %v1087_v25 }
 0x288   : > { %v1493_v27 = vpop.eup %1492 }
 0x289   : > { %v1495_v31 = vpop.eup %1494  ;;  %v1112_v33 = vsub.f32 1.0, %v1493_v27  ;;  %v1128_v16 = vmul.f32 %v1493_v27, %v598_v29 }
 0x28a   : > { %v1497_v37 = vpop.eup %1496  ;;  %v1113_v39 = vsub.f32 1.0, %v1495_v31  ;;  %v1129_v18 = vmul.f32 %v1495_v31, %v600_v30 }
 0x28b   : > { %v1499_v17 = vpop.eup %1498  ;;  %v1114_v43 = vsub.f32 1.0, %v1497_v37  ;;  %v1120_v44 = vmul.f32 %v1112_v33, %v1104_v28  ;;  %v1130_v47 = vmul.f32 %v1497_v37, %v641_v34 }
 0x28c   : > { %v1501_v45 = vpop.eup %1500  ;;  %v1115_v19 = vsub.f32 1.0, %v1499_v17  ;;  %v1121_v46 = vmul.f32 %v1113_v39, %v1105_v32  ;;  %v1131_v48 = vmul.f32 %v1499_v17, %v643_v35 }
 0x28d   : > { %v1503_v21 = vpop.eup %1502  ;;  %v1122_v20 = vmul.f32 %v1114_v43, %v1106_v38  ;;  %v1136_v50 = vadd.f32 %v1128_v16, %v1120_v44  ;;  %v1116_v54 = vsub.f32 1.0, %v1501_v45  ;;  %v1132_v56 = vmul.f32 %v1501_v45, %v602_v36 }
 0x28e   : > { %v1505_v57 = vpop.eup %1504  ;;  %v1123_v58 = vmul.f32 %v1115_v19, %v1107_v42  ;;  %v1137_v61 = vadd.f32 %v1129_v18, %v1121_v46  ;;  %v1117_v0 = vsub.f32 1.0, %v1503_v21  ;;  %v1133_v2 = vmul.f32 %v1503_v21, %v604_v40 }
 0x28f   : > { %v1507_v51 = vpop.eup %1506  ;;  %v1138_v52 = vadd.f32 %v1130_v47, %v1122_v20  ;;  %v1144_v53 = vmul.f32 1.09, %v1136_v50  ;;  %v1118_v3 = vsub.f32 1.0, %v1505_v57  ;;  %v1124_v59 = vmul.f32 %v1116_v54, %v1108_v49 }
 0x290   : > { %v1139_v60 = vadd.f32 %v1131_v48, %v1123_v58  ;;  %v1145_v62 = vmul.f32 1.09, %v1137_v61  ;;  %v1119_v1 = vsub.f32 1.0, %v1507_v51  ;;  %v1125_v4 = vmul.f32 %v1117_v0, %v1109_v22 }
 0x291   : > { %v1146_v5 = vmul.f32 1.09, %v1138_v52  ;;  %1152 = vst [vmem:[%s1729_s11] sm:$0xff] %v1144_v53  ;;  %v1126_v6 = vmul.f32 %v1118_v3, %v1110_v63  ;;  %v1134_v7 = vmul.f32 %v1505_v57, %v645_v41  ;;  %v1135_v8 = vmul.f32 %v1507_v51, %v647_v15 }
 0x292   : > { %v1147_v9 = vmul.f32 1.09, %v1139_v60  ;;  %1153 = vst [vmem:[%s1729_s11 + $0x8] sm:$0xff] %v1145_v62  ;;  %v1127_v10 = vmul.f32 %v1119_v1, %v1111_v55  ;;  %v1140_v11 = vadd.f32 %v1132_v56, %v1124_v59  ;;  %v1141_v12 = vadd.f32 %v1133_v2, %v1125_v4 }
 0x293   : > { %1154 = vst [vmem:[%s1729_s11 + $0x10] sm:$0xff] %v1146_v5  ;;  %v1142_v13 = vadd.f32 %v1134_v7, %v1126_v6 }
 0x294   : > { %1155 = vst.msk [vmem:[%s1729_s11 + $0x18] sm:$0xff] %vm559_vm0, %v1147_v9  ;;  %v1143_v14 = vadd.f32 %v1135_v8, %v1127_v10  ;;  %v1148_v23 = vmul.f32 1.09, %v1140_v11  ;;  %v1149_v24 = vmul.f32 1.09, %v1141_v12 }
 0x295   : > { %v1150_v25 = vmul.f32 1.09, %v1142_v13 }
 0x296   : > { %v1151_v26 = vmul.f32 1.09, %v1143_v14  ;;  %1156 = vst [vmem:[%s1729_s11 + $0x20] sm:$0xff] %v1148_v23  ;;  %1157 = vst [vmem:[%s1729_s11 + $0x28] sm:$0xff] %v1149_v24 }
 0x297   : > { %1158 = vst [vmem:[%s1729_s11 + $0x30] sm:$0xff] %v1150_v25 }
 0x298   : > { %1159 = vst.msk [vmem:[%s1729_s11 + $0x38] sm:$0xff] %vm559_vm0, %v1151_v26 }
 0x299 PF: > { %s17_s24 = sadd.s32 1, %s1514_s24  }
 0x29a   : > { %p14_p4 = scmp.ge.s32.totalorder %s17_s24, 4  }
 0x29c   :  { %16 = sbr.rel (!%p14_p4) target bundleno = 1 (0x1), region = 84 }

</bundles_post_ra>
